<compile_context>
chip_gen: v5e
topology: v5e:2x2
jax: 0.10.0
libtpu: 0.0.40
codegen_flags: <defaults>
</compile_context>

<pallas_src>
import functools

import jax
import jax.numpy as jnp
from jax.experimental import pallas as pl
from jax.experimental.pallas import tpu as pltpu  # noqa: F401  (TPU backend assumed)


# ----------------------------------------------------------------------------
# Generic linear kernel: y = x @ W + b   (W already stored as (in, out)).
# Used for the hoisted GRU input-gate projections (one big MXU matmul).
# ----------------------------------------------------------------------------
def linear_kernel(x_ref, w_ref, b_ref, o_ref):
    o_ref[...] = (
        jnp.dot(x_ref[...], w_ref[...], preferred_element_type=jnp.float32)
        + b_ref[...]
    )


def linear(x, w, b):
    return pl.pallas_call(
        linear_kernel,
        out_shape=jax.ShapeDtypeStruct((x.shape[0], w.shape[1]), jnp.float32),
    )(x, w, b)


# ----------------------------------------------------------------------------
# GRU recurrences.  Input gates gi = x @ W_ih^T + b_ih are PRE-computed and
# hoisted; the kernels only do the recurrent part per step:
#   gh = h @ W_hh^T + b_hh
#   r  = sig(gi_r + gh_r);  z = sig(gi_z + gh_z)
#   n  = tanh(gi_n + r * gh_n);  h' = (1 - z) * n + z * h
# ----------------------------------------------------------------------------
def _gru_cell(gi, h, whh, bhh, H):
    gh = jnp.dot(h, whh, preferred_element_type=jnp.float32) + bhh
    r = jax.nn.sigmoid(gi[:, :H] + gh[:, :H])
    zg = jax.nn.sigmoid(gi[:, H:2 * H] + gh[:, H:2 * H])
    n = jnp.tanh(gi[:, 2 * H:] + r * gh[:, 2 * H:])
    return (1.0 - zg) * n + zg * h


def gru_last_kernel(gi_ref, h0_ref, whh_ref, bhh_ref, hlast_ref):
    # Encoder: only the final hidden state is needed -> no (T,B,H) writeback.
    T = gi_ref.shape[0]
    H = h0_ref.shape[-1]
    whh = whh_ref[...]
    bhh = bhh_ref[...]

    def step(t, h):
        return _gru_cell(gi_ref[t], h, whh, bhh, H)

    hlast_ref[...] = jax.lax.fori_loop(0, T, step, h0_ref[...], unroll=True)


def gru_last(gi, h0, whh_t, bhh):
    B, H = h0.shape
    return pl.pallas_call(
        gru_last_kernel,
        out_shape=jax.ShapeDtypeStruct((B, H), jnp.float32),
    )(gi, h0, whh_t, bhh)


def gru_seq_kernel(gi_ref, gz_ref, h0_ref, whh_ref, bhh_ref, out_ref):
    # Decoder: gz (z-part of the input gates) is constant over time and added
    # in-register, so no [x_emb, z] concat is ever materialized.
    T = gi_ref.shape[0]
    H = h0_ref.shape[-1]
    whh = whh_ref[...]
    bhh = bhh_ref[...]
    gz = gz_ref[...]

    def step(t, h):
        h_new = _gru_cell(gi_ref[t] + gz, h, whh, bhh, H)
        out_ref[t] = h_new
        return h_new

    jax.lax.fori_loop(0, T, step, h0_ref[...], unroll=True)


def gru_seq(gi, gz, h0, whh_t, bhh):
    T = gi.shape[0]
    B, H = h0.shape
    return pl.pallas_call(
        gru_seq_kernel,
        out_shape=jax.ShapeDtypeStruct((T, B, H), jnp.float32),
    )(gi, gz, h0, whh_t, bhh)


# ----------------------------------------------------------------------------
# Fused latent head: q_mu & q_logvar (stacked weight -> one matmul),
# reparameterization, KL, decoder_lat (h0_dec) and the decoder z-gate
# projection (z @ W_ih_z^T) — a single pallas_call, h_last/z stay in VMEM.
# ----------------------------------------------------------------------------
def latent_kernel(h_ref, wmv_ref, bmv_ref, eps_ref, wlat_ref, blat_ref, wzd_ref,
                  z_ref, kl_ref, h0d_ref, gz_ref):
    dz = eps_ref.shape[-1]
    mulv = (
        jnp.dot(h_ref[...], wmv_ref[...], preferred_element_type=jnp.float32)
        + bmv_ref[...]
    )
    mu = mulv[:, :dz]
    lv = mulv[:, dz:]
    z = mu + jnp.exp(lv * 0.5) * eps_ref[...]
    z_ref[...] = z
    kl_per = 0.5 * jnp.sum(jnp.exp(lv) + mu * mu - 1.0 - lv, axis=1, keepdims=True)
    kl_ref[...] = jnp.mean(kl_per, axis=0, keepdims=True)
    h0d_ref[...] = (
        jnp.dot(z, wlat_ref[...], preferred_element_type=jnp.float32) + blat_ref[...]
    )
    gz_ref[...] = jnp.dot(z, wzd_ref[...], preferred_element_type=jnp.float32)


def latent(h_last, wmv, bmv, eps, wlat, blat, wzd):
    B = h_last.shape[0]
    dz = eps.shape[-1]
    d_d_h = wlat.shape[-1]
    g3 = wzd.shape[-1]
    return pl.pallas_call(
        latent_kernel,
        out_shape=(
            jax.ShapeDtypeStruct((B, dz), jnp.float32),
            jax.ShapeDtypeStruct((1, 1), jnp.float32),
            jax.ShapeDtypeStruct((B, d_d_h), jnp.float32),
            jax.ShapeDtypeStruct((B, g3), jnp.float32),
        ),
    )(h_last, wmv, bmv, eps, wlat, blat, wzd)


# ----------------------------------------------------------------------------
# Fused decoder_fc + cross-entropy with integer labels (no (N,V) one-hot).
# ignore_index handled via (label != pad) mask; 0/0 guarded with max(count,1).
# TODO(synk): for realistic N / vocab sizes, tile over rows ("parallel" grid
# axis) and over vocab with an online logsumexp, with per-chip VMEM budgeting.
# ----------------------------------------------------------------------------
def fc_ce_kernel(h_ref, w_ref, b_ref, lab_ref, loss_ref, *, pad_id):
    logits = (
        jnp.dot(h_ref[...], w_ref[...], preferred_element_type=jnp.float32)
        + b_ref[...]
    )
    N, V = logits.shape
    m = jnp.max(logits, axis=-1, keepdims=True)
    lse = m + jnp.log(jnp.sum(jnp.exp(logits - m), axis=-1, keepdims=True))
    logp = logits - lse
    lab = lab_ref[...]                                        # (N, 1) int32
    col = jax.lax.broadcasted_iota(jnp.int32, (N, V), 1)
    sel = jnp.sum(jnp.where(col == lab, logp, 0.0), axis=-1, keepdims=True)  # (N,1)
    valid = (lab != pad_id).astype(jnp.float32)               # (N, 1)
    nll_sum = jnp.sum(-sel * valid, axis=0, keepdims=True)    # (1, 1)
    cnt = jnp.maximum(jnp.sum(valid, axis=0, keepdims=True), 1.0)
    loss_ref[...] = nll_sum / cnt


def fc_cross_entropy(h, w_t, b, labels, pad_id):
    kernel = functools.partial(fc_ce_kernel, pad_id=pad_id)
    return pl.pallas_call(
        kernel,
        out_shape=jax.ShapeDtypeStruct((1, 1), jnp.float32),
    )(h, w_t, b, labels)


# ----------------------------------------------------------------------------
# Full VAE forward (kl_loss, recon_loss)
# ----------------------------------------------------------------------------
def vae_forward(p, tokens, eps, pad_id):
    B, T = tokens.shape
    q_d_h = p["enc_whh_t"].shape[0]
    d_d_h = p["dec_whh_t"].shape[0]
    d_emb = p["emb_w"].shape[1]

    # Embedding gathered directly in time-major layout (no activation transpose).
    tok_tm = tokens.T                                   # (T, B) int32 (tiny)
    x_emb = jnp.take(p["emb_w"], tok_tm, axis=0)        # (T, B, d_emb)  [XLA gather glue]

    # --------------------------- encoder ---------------------------
    # Hoisted input-gate projection: one (T*B, d_emb) x (d_emb, 3H) matmul.
    gi_enc = linear(x_emb.reshape(T * B, d_emb), p["enc_wih_t"], p["enc_bih"])
    gi_enc = gi_enc.reshape(T, B, 3 * q_d_h)
    h0_enc = jnp.zeros((B, q_d_h), jnp.float32)
    h_last = gru_last(gi_enc, h0_enc, p["enc_whh_t"], p["enc_bhh"])   # (B, q_d_h)

    # Fused mu/logvar + reparam + KL + decoder_lat(h0) + decoder z-gates.
    z, kl_loss, h0_dec, gz_dec = latent(
        h_last, p["qmv_w_t"], p["qmv_b"], eps,
        p["dlat_w_t"], p["dlat_b"], p["dec_wih_z_t"])

    # --------------------------- decoder ---------------------------
    # Only the first T-1 timesteps feed the loss (y[:, :-1]); the GRU is causal,
    # so we only run/write those steps.
    Td = T - 1
    gi_dec = linear(x_emb[:Td].reshape(Td * B, d_emb), p["dec_wih_x_t"], p["dec_bih"])
    gi_dec = gi_dec.reshape(Td, B, 3 * d_d_h)
    dec_out = gru_seq(gi_dec, gz_dec, h0_dec, p["dec_whh_t"], p["dec_bhh"])  # (Td,B,H)

    # Row t*B+b of h_flat corresponds to target tokens[b, t+1] (order is
    # irrelevant to the masked mean, only the pairing matters).
    h_flat = dec_out.reshape(Td * B, d_d_h)
    labels = tok_tm[1:].reshape(Td * B, 1).astype(jnp.int32)
    recon_loss = fc_cross_entropy(h_flat, p["dfc_w_t"], p["dfc_b"], labels, pad_id)

    return kl_loss[0, 0], recon_loss[0, 0]


# ----------------------------------------------------------------------------
# Parameter init (PyTorch layout) + one-time preparation (transpose / stack)
# ----------------------------------------------------------------------------
def init_params(key, n_vocab, d_emb, q_d_h, d_z, d_d_h, pad_id):
    ks = iter(jax.random.split(key, 32))

    def u(shape, scale):
        return jax.random.uniform(next(ks), shape, jnp.float32, -scale, scale)

    p = {}
    p["emb_w"] = jax.random.normal(next(ks), (n_vocab, d_emb), jnp.float32)
    p["emb_w"] = p["emb_w"].at[pad_id].set(0.0)            # padding_idx row = 0

    se = 1.0 / jnp.sqrt(q_d_h)
    p["enc_wih"] = u((3 * q_d_h, d_emb), se)
    p["enc_whh"] = u((3 * q_d_h, q_d_h), se)
    p["enc_bih"] = u((3 * q_d_h,), se)
    p["enc_bhh"] = u((3 * q_d_h,), se)

    sq = 1.0 / jnp.sqrt(q_d_h)
    p["qmu_w"] = u((d_z, q_d_h), sq)
    p["qmu_b"] = u((d_z,), sq)
    p["qlv_w"] = u((d_z, q_d_h), sq)
    p["qlv_b"] = u((d_z,), sq)

    sd = 1.0 / jnp.sqrt(d_d_h)
    d_in = d_emb + d_z
    p["dec_wih"] = u((3 * d_d_h, d_in), sd)
    p["dec_whh"] = u((3 * d_d_h, d_d_h), sd)
    p["dec_bih"] = u((3 * d_d_h,), sd)
    p["dec_bhh"] = u((3 * d_d_h,), sd)

    sz = 1.0 / jnp.sqrt(d_z)
    p["dlat_w"] = u((d_d_h, d_z), sz)
    p["dlat_b"] = u((d_d_h,), sz)

    sf = 1.0 / jnp.sqrt(d_d_h)
    p["dfc_w"] = u((n_vocab, d_d_h), sf)
    p["dfc_b"] = u((n_vocab,), sf)
    return p


def prepare_params(p):
    """One-time (outside jit) pre-transpose / stacking into kernel-friendly layout."""
    d_emb = p["emb_w"].shape[1]
    q = {}
    q["emb_w"] = p["emb_w"]
    # encoder GRU
    q["enc_wih_t"] = p["enc_wih"].T                        # (d_emb, 3*q_d_h)
    q["enc_whh_t"] = p["enc_whh"].T                        # (q_d_h, 3*q_d_h)
    q["enc_bih"] = p["enc_bih"].reshape(1, -1)
    q["enc_bhh"] = p["enc_bhh"].reshape(1, -1)
    # stacked q_mu / q_logvar
    q["qmv_w_t"] = jnp.concatenate([p["qmu_w"], p["qlv_w"]], axis=0).T   # (q_d_h, 2*d_z)
    q["qmv_b"] = jnp.concatenate([p["qmu_b"], p["qlv_b"]]).reshape(1, -1)
    # decoder GRU, W_ih split into x-part and z-part
    q["dec_wih_x_t"] = p["dec_wih"][:, :d_emb].T           # (d_emb, 3*d_d_h)
    q["dec_wih_z_t"] = p["dec_wih"][:, d_emb:].T           # (d_z,  3*d_d_h)
    q["dec_whh_t"] = p["dec_whh"].T                        # (d_d_h, 3*d_d_h)
    q["dec_bih"] = p["dec_bih"].reshape(1, -1)
    q["dec_bhh"] = p["dec_bhh"].reshape(1, -1)
    # decoder_lat / decoder_fc
    q["dlat_w_t"] = p["dlat_w"].T                          # (d_z, d_d_h)
    q["dlat_b"] = p["dlat_b"].reshape(1, -1)
    q["dfc_w_t"] = p["dfc_w"].T                            # (d_d_h, n_vocab)
    q["dfc_b"] = p["dfc_b"].reshape(1, -1)
    return q


if __name__ == "__main__":
    # Small config: vocab=16, d_emb=32, q_d_h=32, d_z=16, d_d_h=32,
    # q_n_layers=d_n_layers=1, q_bidir=False, batch=2, seq=8.
    # TODO(synk): pad B->8 (sublane) and hidden/gate widths ->128 (lane) with
    # masking for lane-dense stores at production sizes.
    n_vocab, d_emb, q_d_h, d_z, d_d_h = 16, 32, 32, 16, 32
    B, T = 2, 8
    pad_id, bos_id, eos_id = 0, 1, 2

    key = jax.random.PRNGKey(0)
    k_params, k_tok, k_eps = jax.random.split(key, 3)

    params = init_params(k_params, n_vocab, d_emb, q_d_h, d_z, d_d_h, pad_id)
    prep = prepare_params(params)   # pre-transposed once, outside the jitted forward

    # Equal-length token sequences: <bos> body... <eos>
    body = jax.random.randint(k_tok, (B, T), 3, n_vocab, dtype=jnp.int32)
    tokens = body.at[:, 0].set(bos_id).at[:, -1].set(eos_id)

    eps = jax.random.normal(k_eps, (B, d_z), jnp.float32)   # randn_like(mu)

    fwd = jax.jit(functools.partial(vae_forward, pad_id=pad_id))
    kl_loss, recon_loss = fwd(prep, tokens, eps)
    jax.block_until_ready((kl_loss, recon_loss))

    assert jnp.isfinite(kl_loss) and jnp.isfinite(recon_loss)
    print("KERNEL_OK")
</pallas_src>

<mosaic_0001>
module attributes {stable_mosaic.version = 11 : i64} {
  func.func @linear_kernel(%arg0: memref<14x32xf32, #tpu.memory_space<vmem>>, %arg1: memref<32x96xf32, #tpu.memory_space<vmem>>, %arg2: memref<1x96xf32, #tpu.memory_space<vmem>>, %arg3: memref<14x96xf32, #tpu.memory_space<vmem>>) attributes {dimension_semantics = [], scalar_prefetch = 0 : i64, scratch_operands = 0 : i64, tpu.core_type = #tpu.core_type<tc>} {
    %c0 = arith.constant 0 : index
    %c0_0 = arith.constant 0 : index
    %0 = vector.load %arg0[%c0, %c0_0] : memref<14x32xf32, #tpu.memory_space<vmem>>, vector<14x32xf32>
    %c0_1 = arith.constant 0 : index
    %c0_2 = arith.constant 0 : index
    %1 = vector.load %arg1[%c0_1, %c0_2] : memref<32x96xf32, #tpu.memory_space<vmem>>, vector<32x96xf32>
    %cst = arith.constant dense<0.000000e+00> : vector<14x96xf32>
    %2 = tpu.matmul %0, %1, %cst {dimension_numbers = #tpu.dot_dimension_numbers<[1], [0], [0], [1], [0, 0, 1, 1], [], []>} : vector<14x32xf32>, vector<32x96xf32>, vector<14x96xf32> -> vector<14x96xf32>
    %c0_3 = arith.constant 0 : index
    %c0_4 = arith.constant 0 : index
    %3 = vector.load %arg2[%c0_3, %c0_4] : memref<1x96xf32, #tpu.memory_space<vmem>>, vector<1x96xf32>
    %4 = vector.broadcast %3 : vector<1x96xf32> to vector<14x96xf32>
    %5 = arith.addf %2, %4 : vector<14x96xf32>
    %c0_5 = arith.constant 0 : index
    %c0_6 = arith.constant 0 : index
    %6 = vector.load %arg3[%c0_5, %c0_6] : memref<14x96xf32, #tpu.memory_space<vmem>>, vector<14x96xf32>
    tpu.vector_store %arg3[%c0_5, %c0_6], %5 {strides = array<i32>} : memref<14x96xf32, #tpu.memory_space<vmem>>, vector<14x96xf32>,
    return
  }
}

module attributes {stable_mosaic.version = 11 : i64} {
  func.func @latent_kernel(%arg0: memref<2x32xf32, #tpu.memory_space<vmem>>, %arg1: memref<32x32xf32, #tpu.memory_space<vmem>>, %arg2: memref<1x32xf32, #tpu.memory_space<vmem>>, %arg3: memref<2x16xf32, #tpu.memory_space<vmem>>, %arg4: memref<16x32xf32, #tpu.memory_space<vmem>>, %arg5: memref<1x32xf32, #tpu.memory_space<vmem>>, %arg6: memref<16x96xf32, #tpu.memory_space<vmem>>, %arg7: memref<2x16xf32, #tpu.memory_space<vmem>>, %arg8: memref<1x1xf32, #tpu.memory_space<vmem>>, %arg9: memref<2x32xf32, #tpu.memory_space<vmem>>, %arg10: memref<2x96xf32, #tpu.memory_space<vmem>>) attributes {dimension_semantics = [], scalar_prefetch = 0 : i64, scratch_operands = 0 : i64, tpu.core_type = #tpu.core_type<tc>} {
    %c0 = arith.constant 0 : index
    %c0_0 = arith.constant 0 : index
    %0 = vector.load %arg0[%c0, %c0_0] : memref<2x32xf32, #tpu.memory_space<vmem>>, vector<2x32xf32>
    %c0_1 = arith.constant 0 : index
    %c0_2 = arith.constant 0 : index
    %1 = vector.load %arg1[%c0_1, %c0_2] : memref<32x32xf32, #tpu.memory_space<vmem>>, vector<32x32xf32>
    %cst = arith.constant dense<0.000000e+00> : vector<2x32xf32>
    %2 = tpu.matmul %0, %1, %cst {dimension_numbers = #tpu.dot_dimension_numbers<[1], [0], [0], [1], [0, 0, 1, 1], [], []>} : vector<2x32xf32>, vector<32x32xf32>, vector<2x32xf32> -> vector<2x32xf32>
    %c0_3 = arith.constant 0 : index
    %c0_4 = arith.constant 0 : index
    %3 = vector.load %arg2[%c0_3, %c0_4] : memref<1x32xf32, #tpu.memory_space<vmem>>, vector<1x32xf32>
    %4 = vector.broadcast %3 : vector<1x32xf32> to vector<2x32xf32>
    %5 = arith.addf %2, %4 : vector<2x32xf32>
    %6 = vector.extract_strided_slice %5 {offsets = [0, 0], sizes = [2, 16], strides = [1, 1]} : vector<2x32xf32> to vector<2x16xf32>
    %7 = vector.extract_strided_slice %5 {offsets = [0, 16], sizes = [2, 16], strides = [1, 1]} : vector<2x32xf32> to vector<2x16xf32>
    %cst_5 = arith.constant 5.000000e-01 : f32
    %8 = vector.broadcast %cst_5 : f32 to vector<2x16xf32>
    %9 = arith.mulf %7, %8 : vector<2x16xf32>
    %10 = math.exp %9 : vector<2x16xf32>
    %c0_6 = arith.constant 0 : index
    %c0_7 = arith.constant 0 : index
    %11 = vector.load %arg3[%c0_6, %c0_7] : memref<2x16xf32, #tpu.memory_space<vmem>>, vector<2x16xf32>
    %12 = arith.mulf %10, %11 : vector<2x16xf32>
    %13 = arith.addf %6, %12 : vector<2x16xf32>
    %c0_8 = arith.constant 0 : index
    %c0_9 = arith.constant 0 : index
    %14 = vector.load %arg7[%c0_8, %c0_9] : memref<2x16xf32, #tpu.memory_space<vmem>>, vector<2x16xf32>
    tpu.vector_store %arg7[%c0_8, %c0_9], %13 {strides = array<i32>} : memref<2x16xf32, #tpu.memory_space<vmem>>, vector<2x16xf32>,
    %15 = math.exp %7 : vector<2x16xf32>
    %16 = arith.mulf %6, %6 : vector<2x16xf32>
    %17 = arith.addf %15, %16 : vector<2x16xf32>
    %cst_10 = arith.constant 1.000000e+00 : f32
    %18 = vector.broadcast %cst_10 : f32 to vector<2x16xf32>
    %19 = arith.subf %17, %18 : vector<2x16xf32>
    %20 = arith.subf %19, %7 : vector<2x16xf32>
    %cst_11 = arith.constant dense<0.000000e+00> : vector<2xf32>
    %21 = vector.multi_reduction <add>, %20, %cst_11 [1] : vector<2x16xf32> to vector<2xf32>
    %22 = vector.shape_cast %21 : vector<2xf32> to vector<2x1xf32>
    %cst_12 = arith.constant 5.000000e-01 : f32
    %23 = vector.broadcast %cst_12 : f32 to vector<2x1xf32>
    %24 = arith.mulf %23, %22 : vector<2x1xf32>
    %cst_13 = arith.constant dense<0.000000e+00> : vector<1xf32>
    %25 = vector.multi_reduction <add>, %24, %cst_13 [0] : vector<2x1xf32> to vector<1xf32>
    %26 = vector.shape_cast %25 : vector<1xf32> to vector<1x1xf32>
    %cst_14 = arith.constant 2.000000e+00 : f32
    %27 = vector.broadcast %cst_14 : f32 to vector<1x1xf32>
    %28 = arith.divf %26, %27 : vector<1x1xf32>
    %c0_15 = arith.constant 0 : index
    %c0_16 = arith.constant 0 : index
    %29 = vector.load %arg8[%c0_15, %c0_16] : memref<1x1xf32, #tpu.memory_space<vmem>>, vector<1x1xf32>
    tpu.vector_store %arg8[%c0_15, %c0_16], %28 {strides = array<i32>} : memref<1x1xf32, #tpu.memory_space<vmem>>, vector<1x1xf32>,
    %c0_17 = arith.constant 0 : index
    %c0_18 = arith.constant 0 : index
    %30 = vector.load %arg4[%c0_17, %c0_18] : memref<16x32xf32, #tpu.memory_space<vmem>>, vector<16x32xf32>
    %cst_19 = arith.constant dense<0.000000e+00> : vector<2x32xf32>
    %31 = tpu.matmul %13, %30, %cst_19 {dimension_numbers = #tpu.dot_dimension_numbers<[1], [0], [0], [1], [0, 0, 1, 1], [], []>} : vector<2x16xf32>, vector<16x32xf32>, vector<2x32xf32> -> vector<2x32xf32>
    %c0_20 = arith.constant 0 : index
    %c0_21 = arith.constant 0 : index
    %32 = vector.load %arg5[%c0_20, %c0_21] : memref<1x32xf32, #tpu.memory_space<vmem>>, vector<1x32xf32>
    %33 = vector.broadcast %32 : vector<1x32xf32> to vector<2x32xf32>
    %34 = arith.addf %31, %33 : vector<2x32xf32>
    %c0_22 = arith.constant 0 : index
    %c0_23 = arith.constant 0 : index
    %35 = vector.load %arg9[%c0_22, %c0_23] : memref<2x32xf32, #tpu.memory_space<vmem>>, vector<2x32xf32>
    tpu.vector_store %arg9[%c0_22, %c0_23], %34 {strides = array<i32>} : memref<2x32xf32, #tpu.memory_space<vmem>>, vector<2x32xf32>,
    %c0_24 = arith.constant 0 : index
    %c0_25 = arith.constant 0 : index
    %36 = vector.load %arg6[%c0_24, %c0_25] : memref<16x96xf32, #tpu.memory_space<vmem>>, vector<16x96xf32>
    %cst_26 = arith.constant dense<0.000000e+00> : vector<2x96xf32>
    %37 = tpu.matmul %13, %36, %cst_26 {dimension_numbers = #tpu.dot_dimension_numbers<[1], [0], [0], [1], [0, 0, 1, 1], [], []>} : vector<2x16xf32>, vector<16x96xf32>, vector<2x96xf32> -> vector<2x96xf32>
    %c0_27 = arith.constant 0 : index
    %c0_28 = arith.constant 0 : index
    %38 = vector.load %arg10[%c0_27, %c0_28] : memref<2x96xf32, #tpu.memory_space<vmem>>, vector<2x96xf32>
    tpu.vector_store %arg10[%c0_27, %c0_28], %37 {strides = array<i32>} : memref<2x96xf32, #tpu.memory_space<vmem>>, vector<2x96xf32>,
    return
  }
}

module attributes {stable_mosaic.version = 11 : i64} {
  func.func @linear_kernel(%arg0: memref<16x32xf32, #tpu.memory_space<vmem>>, %arg1: memref<32x96xf32, #tpu.memory_space<vmem>>, %arg2: memref<1x96xf32, #tpu.memory_space<vmem>>, %arg3: memref<16x96xf32, #tpu.memory_space<vmem>>) attributes {dimension_semantics = [], scalar_prefetch = 0 : i64, scratch_operands = 0 : i64, tpu.core_type = #tpu.core_type<tc>} {
    %c0 = arith.constant 0 : index
    %c0_0 = arith.constant 0 : index
    %0 = vector.load %arg0[%c0, %c0_0] : memref<16x32xf32, #tpu.memory_space<vmem>>, vector<16x32xf32>
    %c0_1 = arith.constant 0 : index
    %c0_2 = arith.constant 0 : index
    %1 = vector.load %arg1[%c0_1, %c0_2] : memref<32x96xf32, #tpu.memory_space<vmem>>, vector<32x96xf32>
    %cst = arith.constant dense<0.000000e+00> : vector<16x96xf32>
    %2 = tpu.matmul %0, %1, %cst {dimension_numbers = #tpu.dot_dimension_numbers<[1], [0], [0], [1], [0, 0, 1, 1], [], []>} : vector<16x32xf32>, vector<32x96xf32>, vector<16x96xf32> -> vector<16x96xf32>
    %c0_3 = arith.constant 0 : index
    %c0_4 = arith.constant 0 : index
    %3 = vector.load %arg2[%c0_3, %c0_4] : memref<1x96xf32, #tpu.memory_space<vmem>>, vector<1x96xf32>
    %4 = vector.broadcast %3 : vector<1x96xf32> to vector<16x96xf32>
    %5 = arith.addf %2, %4 : vector<16x96xf32>
    %c0_5 = arith.constant 0 : index
    %c0_6 = arith.constant 0 : index
    %6 = vector.load %arg3[%c0_5, %c0_6] : memref<16x96xf32, #tpu.memory_space<vmem>>, vector<16x96xf32>
    tpu.vector_store %arg3[%c0_5, %c0_6], %5 {strides = array<i32>} : memref<16x96xf32, #tpu.memory_space<vmem>>, vector<16x96xf32>,
    return
  }
}

module attributes {stable_mosaic.version = 11 : i64} {
  func.func @gru_last_kernel(%arg0: memref<8x2x96xf32, #tpu.memory_space<vmem>>, %arg1: memref<2x32xf32, #tpu.memory_space<vmem>>, %arg2: memref<32x96xf32, #tpu.memory_space<vmem>>, %arg3: memref<1x96xf32, #tpu.memory_space<vmem>>, %arg4: memref<2x32xf32, #tpu.memory_space<vmem>>) attributes {dimension_semantics = [], scalar_prefetch = 0 : i64, scratch_operands = 0 : i64, tpu.core_type = #tpu.core_type<tc>} {
    %c0 = arith.constant 0 : index
    %c0_0 = arith.constant 0 : index
    %0 = vector.load %arg2[%c0, %c0_0] : memref<32x96xf32, #tpu.memory_space<vmem>>, vector<32x96xf32>
    %c0_1 = arith.constant 0 : index
    %c0_2 = arith.constant 0 : index
    %1 = vector.load %arg3[%c0_1, %c0_2] : memref<1x96xf32, #tpu.memory_space<vmem>>, vector<1x96xf32>
    %c0_3 = arith.constant 0 : index
    %c0_4 = arith.constant 0 : index
    %2 = vector.load %arg1[%c0_3, %c0_4] : memref<2x32xf32, #tpu.memory_space<vmem>>, vector<2x32xf32>
    %c0_i32 = arith.constant 0 : i32
    %3 = arith.index_cast %c0_i32 : i32 to index
    %c0_5 = arith.constant 0 : index
    %c0_6 = arith.constant 0 : index
    %4 = vector.load %arg0[%3, %c0_5, %c0_6] : memref<8x2x96xf32, #tpu.memory_space<vmem>>, vector<1x2x96xf32>
    %5 = vector.shape_cast %4 : vector<1x2x96xf32> to vector<2x96xf32>
    %cst = arith.constant dense<0.000000e+00> : vector<2x96xf32>
    %6 = tpu.matmul %2, %0, %cst {dimension_numbers = #tpu.dot_dimension_numbers<[1], [0], [0], [1], [0, 0, 1, 1], [], []>} : vector<2x32xf32>, vector<32x96xf32>, vector<2x96xf32> -> vector<2x96xf32>
    %7 = vector.broadcast %1 : vector<1x96xf32> to vector<2x96xf32>
    %8 = arith.addf %6, %7 : vector<2x96xf32>
    %9 = vector.extract_strided_slice %5 {offsets = [0, 0], sizes = [2, 32], strides = [1, 1]} : vector<2x96xf32> to vector<2x32xf32>
    %10 = vector.extract_strided_slice %8 {offsets = [0, 0], sizes = [2, 32], strides = [1, 1]} : vector<2x96xf32> to vector<2x32xf32>
    %11 = arith.addf %9, %10 : vector<2x32xf32>
    %12 = arith.negf %11 : vector<2x32xf32>
    %13 = math.exp %12 : vector<2x32xf32>
    %cst_7 = arith.constant 1.000000e+00 : f32
    %14 = vector.broadcast %cst_7 : f32 to vector<2x32xf32>
    %15 = arith.addf %14, %13 : vector<2x32xf32>
    %16 = arith.divf %14, %15 : vector<2x32xf32>
    %17 = vector.extract_strided_slice %5 {offsets = [0, 32], sizes = [2, 32], strides = [1, 1]} : vector<2x96xf32> to vector<2x32xf32>
    %18 = vector.extract_strided_slice %8 {offsets = [0, 32], sizes = [2, 32], strides = [1, 1]} : vector<2x96xf32> to vector<2x32xf32>
    %19 = arith.addf %17, %18 : vector<2x32xf32>
    %20 = arith.negf %19 : vector<2x32xf32>
    %21 = math.exp %20 : vector<2x32xf32>
    %cst_8 = arith.constant 1.000000e+00 : f32
    %22 = vector.broadcast %cst_8 : f32 to vector<2x32xf32>
    %23 = arith.addf %22, %21 : vector<2x32xf32>
    %24 = arith.divf %22, %23 : vector<2x32xf32>
    %25 = vector.extract_strided_slice %5 {offsets = [0, 64], sizes = [2, 32], strides = [1, 1]} : vector<2x96xf32> to vector<2x32xf32>
    %26 = vector.extract_strided_slice %8 {offsets = [0, 64], sizes = [2, 32], strides = [1, 1]} : vector<2x96xf32> to vector<2x32xf32>
    %27 = arith.mulf %16, %26 : vector<2x32xf32>
    %28 = arith.addf %25, %27 : vector<2x32xf32>
    %29 = math.tanh %28 : vector<2x32xf32>
    %cst_9 = arith.constant 1.000000e+00 : f32
    %30 = vector.broadcast %cst_9 : f32 to vector<2x32xf32>
    %31 = arith.subf %30, %24 : vector<2x32xf32>
    %32 = arith.mulf %31, %29 : vector<2x32xf32>
    %33 = arith.mulf %24, %2 : vector<2x32xf32>
    %34 = arith.addf %32, %33 : vector<2x32xf32>
    %c1_i32 = arith.constant 1 : i32
    %35 = arith.index_cast %c1_i32 : i32 to index
    %c0_10 = arith.constant 0 : index
    %c0_11 = arith.constant 0 : index
    %36 = vector.load %arg0[%35, %c0_10, %c0_11] : memref<8x2x96xf32, #tpu.memory_space<vmem>>, vector<1x2x96xf32>
    %37 = vector.shape_cast %36 : vector<1x2x96xf32> to vector<2x96xf32>
    %cst_12 = arith.constant dense<0.000000e+00> : vector<2x96xf32>
    %38 = tpu.matmul %34, %0, %cst_12 {dimension_numbers = #tpu.dot_dimension_numbers<[1], [0], [0], [1], [0, 0, 1, 1], [], []>} : vector<2x32xf32>, vector<32x96xf32>, vector<2x96xf32> -> vector<2x96xf32>
    %39 = vector.broadcast %1 : vector<1x96xf32> to vector<2x96xf32>
    %40 = arith.addf %38, %39 : vector<2x96xf32>
    %41 = vector.extract_strided_slice %37 {offsets = [0, 0], sizes = [2, 32], strides = [1, 1]} : vector<2x96xf32> to vector<2x32xf32>
    %42 = vector.extract_strided_slice %40 {offsets = [0, 0], sizes = [2, 32], strides = [1, 1]} : vector<2x96xf32> to vector<2x32xf32>
    %43 = arith.addf %41, %42 : vector<2x32xf32>
    %44 = arith.negf %43 : vector<2x32xf32>
    %45 = math.exp %44 : vector<2x32xf32>
    %cst_13 = arith.constant 1.000000e+00 : f32
    %46 = vector.broadcast %cst_13 : f32 to vector<2x32xf32>
    %47 = arith.addf %46, %45 : vector<2x32xf32>
    %48 = arith.divf %46, %47 : vector<2x32xf32>
    %49 = vector.extract_strided_slice %37 {offsets = [0, 32], sizes = [2, 32], strides = [1, 1]} : vector<2x96xf32> to vector<2x32xf32>
    %50 = vector.extract_strided_slice %40 {offsets = [0, 32], sizes = [2, 32], strides = [1, 1]} : vector<2x96xf32> to vector<2x32xf32>
    %51 = arith.addf %49, %50 : vector<2x32xf32>
    %52 = arith.negf %51 : vector<2x32xf32>
    %53 = math.exp %52 : vector<2x32xf32>
    %cst_14 = arith.constant 1.000000e+00 : f32
    %54 = vector.broadcast %cst_14 : f32 to vector<2x32xf32>
    %55 = arith.addf %54, %53 : vector<2x32xf32>
    %56 = arith.divf %54, %55 : vector<2x32xf32>
    %57 = vector.extract_strided_slice %37 {offsets = [0, 64], sizes = [2, 32], strides = [1, 1]} : vector<2x96xf32> to vector<2x32xf32>
    %58 = vector.extract_strided_slice %40 {offsets = [0, 64], sizes = [2, 32], strides = [1, 1]} : vector<2x96xf32> to vector<2x32xf32>
    %59 = arith.mulf %48, %58 : vector<2x32xf32>
    %60 = arith.addf %57, %59 : vector<2x32xf32>
    %61 = math.tanh %60 : vector<2x32xf32>
    %cst_15 = arith.constant 1.000000e+00 : f32
    %62 = vector.broadcast %cst_15 : f32 to vector<2x32xf32>
    %63 = arith.subf %62, %56 : vector<2x32xf32>
    %64 = arith.mulf %63, %61 : vector<2x32xf32>
    %65 = arith.mulf %56, %34 : vector<2x32xf32>
    %66 = arith.addf %64, %65 : vector<2x32xf32>
    %c2_i32 = arith.constant 2 : i32
    %67 = arith.index_cast %c2_i32 : i32 to index
    %c0_16 = arith.constant 0 : index
    %c0_17 = arith.constant 0 : index
    %68 = vector.load %arg0[%67, %c0_16, %c0_17] : memref<8x2x96xf32, #tpu.memory_space<vmem>>, vector<1x2x96xf32>
    %69 = vector.shape_cast %68 : vector<1x2x96xf32> to vector<2x96xf32>
    %cst_18 = arith.constant dense<0.000000e+00> : vector<2x96xf32>
    %70 = tpu.matmul %66, %0, %cst_18 {dimension_numbers = #tpu.dot_dimension_numbers<[1], [0], [0], [1], [0, 0, 1, 1], [], []>} : vector<2x32xf32>, vector<32x96xf32>, vector<2x96xf32> -> vector<2x96xf32>
    %71 = vector.broadcast %1 : vector<1x96xf32> to vector<2x96xf32>
    %72 = arith.addf %70, %71 : vector<2x96xf32>
    %73 = vector.extract_strided_slice %69 {offsets = [0, 0], sizes = [2, 32], strides = [1, 1]} : vector<2x96xf32> to vector<2x32xf32>
    %74 = vector.extract_strided_slice %72 {offsets = [0, 0], sizes = [2, 32], strides = [1, 1]} : vector<2x96xf32> to vector<2x32xf32>
    %75 = arith.addf %73, %74 : vector<2x32xf32>
    %76 = arith.negf %75 : vector<2x32xf32>
    %77 = math.exp %76 : vector<2x32xf32>
    %cst_19 = arith.constant 1.000000e+00 : f32
    %78 = vector.broadcast %cst_19 : f32 to vector<2x32xf32>
    %79 = arith.addf %78, %77 : vector<2x32xf32>
    %80 = arith.divf %78, %79 : vector<2x32xf32>
    %81 = vector.extract_strided_slice %69 {offsets = [0, 32], sizes = [2, 32], strides = [1, 1]} : vector<2x96xf32> to vector<2x32xf32>
    %82 = vector.extract_strided_slice %72 {offsets = [0, 32], sizes = [2, 32], strides = [1, 1]} : vector<2x96xf32> to vector<2x32xf32>
    %83 = arith.addf %81, %82 : vector<2x32xf32>
    %84 = arith.negf %83 : vector<2x32xf32>
    %85 = math.exp %84 : vector<2x32xf32>
    %cst_20 = arith.constant 1.000000e+00 : f32
    %86 = vector.broadcast %cst_20 : f32 to vector<2x32xf32>
    %87 = arith.addf %86, %85 : vector<2x32xf32>
    %88 = arith.divf %86, %87 : vector<2x32xf32>
    %89 = vector.extract_strided_slice %69 {offsets = [0, 64], sizes = [2, 32], strides = [1, 1]} : vector<2x96xf32> to vector<2x32xf32>
    %90 = vector.extract_strided_slice %72 {offsets = [0, 64], sizes = [2, 32], strides = [1, 1]} : vector<2x96xf32> to vector<2x32xf32>
    %91 = arith.mulf %80, %90 : vector<2x32xf32>
    %92 = arith.addf %89, %91 : vector<2x32xf32>
    %93 = math.tanh %92 : vector<2x32xf32>
    %cst_21 = arith.constant 1.000000e+00 : f32
    %94 = vector.broadcast %cst_21 : f32 to vector<2x32xf32>
    %95 = arith.subf %94, %88 : vector<2x32xf32>
    %96 = arith.mulf %95, %93 : vector<2x32xf32>
    %97 = arith.mulf %88, %66 : vector<2x32xf32>
    %98 = arith.addf %96, %97 : vector<2x32xf32>
    %c3_i32 = arith.constant 3 : i32
    %99 = arith.index_cast %c3_i32 : i32 to index
    %c0_22 = arith.constant 0 : index
    %c0_23 = arith.constant 0 : index
    %100 = vector.load %arg0[%99, %c0_22, %c0_23] : memref<8x2x96xf32, #tpu.memory_space<vmem>>, vector<1x2x96xf32>
    %101 = vector.shape_cast %100 : vector<1x2x96xf32> to vector<2x96xf32>
    %cst_24 = arith.constant dense<0.000000e+00> : vector<2x96xf32>
    %102 = tpu.matmul %98, %0, %cst_24 {dimension_numbers = #tpu.dot_dimension_numbers<[1], [0], [0], [1], [0, 0, 1, 1], [], []>} : vector<2x32xf32>, vector<32x96xf32>, vector<2x96xf32> -> vector<2x96xf32>
    %103 = vector.broadcast %1 : vector<1x96xf32> to vector<2x96xf32>
    %104 = arith.addf %102, %103 : vector<2x96xf32>
    %105 = vector.extract_strided_slice %101 {offsets = [0, 0], sizes = [2, 32], strides = [1, 1]} : vector<2x96xf32> to vector<2x32xf32>
    %106 = vector.extract_strided_slice %104 {offsets = [0, 0], sizes = [2, 32], strides = [1, 1]} : vector<2x96xf32> to vector<2x32xf32>
    %107 = arith.addf %105, %106 : vector<2x32xf32>
    %108 = arith.negf %107 : vector<2x32xf32>
    %109 = math.exp %108 : vector<2x32xf32>
    %cst_25 = arith.constant 1.000000e+00 : f32
    %110 = vector.broadcast %cst_25 : f32 to vector<2x32xf32>
    %111 = arith.addf %110, %109 : vector<2x32xf32>
    %112 = arith.divf %110, %111 : vector<2x32xf32>
    %113 = vector.extract_strided_slice %101 {offsets = [0, 32], sizes = [2, 32], strides = [1, 1]} : vector<2x96xf32> to vector<2x32xf32>
    %114 = vector.extract_strided_slice %104 {offsets = [0, 32], sizes = [2, 32], strides = [1, 1]} : vector<2x96xf32> to vector<2x32xf32>
    %115 = arith.addf %113, %114 : vector<2x32xf32>
    %116 = arith.negf %115 : vector<2x32xf32>
    %117 = math.exp %116 : vector<2x32xf32>
    %cst_26 = arith.constant 1.000000e+00 : f32
    %118 = vector.broadcast %cst_26 : f32 to vector<2x32xf32>
    %119 = arith.addf %118, %117 : vector<2x32xf32>
    %120 = arith.divf %118, %119 : vector<2x32xf32>
    %121 = vector.extract_strided_slice %101 {offsets = [0, 64], sizes = [2, 32], strides = [1, 1]} : vector<2x96xf32> to vector<2x32xf32>
    %122 = vector.extract_strided_slice %104 {offsets = [0, 64], sizes = [2, 32], strides = [1, 1]} : vector<2x96xf32> to vector<2x32xf32>
    %123 = arith.mulf %112, %122 : vector<2x32xf32>
    %124 = arith.addf %121, %123 : vector<2x32xf32>
    %125 = math.tanh %124 : vector<2x32xf32>
    %cst_27 = arith.constant 1.000000e+00 : f32
    %126 = vector.broadcast %cst_27 : f32 to vector<2x32xf32>
    %127 = arith.subf %126, %120 : vector<2x32xf32>
    %128 = arith.mulf %127, %125 : vector<2x32xf32>
    %129 = arith.mulf %120, %98 : vector<2x32xf32>
    %130 = arith.addf %128, %129 : vector<2x32xf32>
    %c4_i32 = arith.constant 4 : i32
    %131 = arith.index_cast %c4_i32 : i32 to index
    %c0_28 = arith.constant 0 : index
    %c0_29 = arith.constant 0 : index
    %132 = vector.load %arg0[%131, %c0_28, %c0_29] : memref<8x2x96xf32, #tpu.memory_space<vmem>>, vector<1x2x96xf32>
    %133 = vector.shape_cast %132 : vector<1x2x96xf32> to vector<2x96xf32>
    %cst_30 = arith.constant dense<0.000000e+00> : vector<2x96xf32>
    %134 = tpu.matmul %130, %0, %cst_30 {dimension_numbers = #tpu.dot_dimension_numbers<[1], [0], [0], [1], [0, 0, 1, 1], [], []>} : vector<2x32xf32>, vector<32x96xf32>, vector<2x96xf32> -> vector<2x96xf32>
    %135 = vector.broadcast %1 : vector<1x96xf32> to vector<2x96xf32>
    %136 = arith.addf %134, %135 : vector<2x96xf32>
    %137 = vector.extract_strided_slice %133 {offsets = [0, 0], sizes = [2, 32], strides = [1, 1]} : vector<2x96xf32> to vector<2x32xf32>
    %138 = vector.extract_strided_slice %136 {offsets = [0, 0], sizes = [2, 32], strides = [1, 1]} : vector<2x96xf32> to vector<2x32xf32>
    %139 = arith.addf %137, %138 : vector<2x32xf32>
    %140 = arith.negf %139 : vector<2x32xf32>
    %141 = math.exp %140 : vector<2x32xf32>
    %cst_31 = arith.constant 1.000000e+00 : f32
    %142 = vector.broadcast %cst_31 : f32 to vector<2x32xf32>
    %143 = arith.addf %142, %141 : vector<2x32xf32>
    %144 = arith.divf %142, %143 : vector<2x32xf32>
    %145 = vector.extract_strided_slice %133 {offsets = [0, 32], sizes = [2, 32], strides = [1, 1]} : vector<2x96xf32> to vector<2x32xf32>
    %146 = vector.extract_strided_slice %136 {offsets = [0, 32], sizes = [2, 32], strides = [1, 1]} : vector<2x96xf32> to vector<2x32xf32>
    %147 = arith.addf %145, %146 : vector<2x32xf32>
    %148 = arith.negf %147 : vector<2x32xf32>
    %149 = math.exp %148 : vector<2x32xf32>
    %cst_32 = arith.constant 1.000000e+00 : f32
    %150 = vector.broadcast %cst_32 : f32 to vector<2x32xf32>
    %151 = arith.addf %150, %149 : vector<2x32xf32>
    %152 = arith.divf %150, %151 : vector<2x32xf32>
    %153 = vector.extract_strided_slice %133 {offsets = [0, 64], sizes = [2, 32], strides = [1, 1]} : vector<2x96xf32> to vector<2x32xf32>
    %154 = vector.extract_strided_slice %136 {offsets = [0, 64], sizes = [2, 32], strides = [1, 1]} : vector<2x96xf32> to vector<2x32xf32>
    %155 = arith.mulf %144, %154 : vector<2x32xf32>
    %156 = arith.addf %153, %155 : vector<2x32xf32>
    %157 = math.tanh %156 : vector<2x32xf32>
    %cst_33 = arith.constant 1.000000e+00 : f32
    %158 = vector.broadcast %cst_33 : f32 to vector<2x32xf32>
    %159 = arith.subf %158, %152 : vector<2x32xf32>
    %160 = arith.mulf %159, %157 : vector<2x32xf32>
    %161 = arith.mulf %152, %130 : vector<2x32xf32>
    %162 = arith.addf %160, %161 : vector<2x32xf32>
    %c5_i32 = arith.constant 5 : i32
    %163 = arith.index_cast %c5_i32 : i32 to index
    %c0_34 = arith.constant 0 : index
    %c0_35 = arith.constant 0 : index
    %164 = vector.load %arg0[%163, %c0_34, %c0_35] : memref<8x2x96xf32, #tpu.memory_space<vmem>>, vector<1x2x96xf32>
    %165 = vector.shape_cast %164 : vector<1x2x96xf32> to vector<2x96xf32>
    %cst_36 = arith.constant dense<0.000000e+00> : vector<2x96xf32>
    %166 = tpu.matmul %162, %0, %cst_36 {dimension_numbers = #tpu.dot_dimension_numbers<[1], [0], [0], [1], [0, 0, 1, 1], [], []>} : vector<2x32xf32>, vector<32x96xf32>, vector<2x96xf32> -> vector<2x96xf32>
    %167 = vector.broadcast %1 : vector<1x96xf32> to vector<2x96xf32>
    %168 = arith.addf %166, %167 : vector<2x96xf32>
    %169 = vector.extract_strided_slice %165 {offsets = [0, 0], sizes = [2, 32], strides = [1, 1]} : vector<2x96xf32> to vector<2x32xf32>
    %170 = vector.extract_strided_slice %168 {offsets = [0, 0], sizes = [2, 32], strides = [1, 1]} : vector<2x96xf32> to vector<2x32xf32>
    %171 = arith.addf %169, %170 : vector<2x32xf32>
    %172 = arith.negf %171 : vector<2x32xf32>
    %173 = math.exp %172 : vector<2x32xf32>
    %cst_37 = arith.constant 1.000000e+00 : f32
    %174 = vector.broadcast %cst_37 : f32 to vector<2x32xf32>
    %175 = arith.addf %174, %173 : vector<2x32xf32>
    %176 = arith.divf %174, %175 : vector<2x32xf32>
    %177 = vector.extract_strided_slice %165 {offsets = [0, 32], sizes = [2, 32], strides = [1, 1]} : vector<2x96xf32> to vector<2x32xf32>
    %178 = vector.extract_strided_slice %168 {offsets = [0, 32], sizes = [2, 32], strides = [1, 1]} : vector<2x96xf32> to vector<2x32xf32>
    %179 = arith.addf %177, %178 : vector<2x32xf32>
    %180 = arith.negf %179 : vector<2x32xf32>
    %181 = math.exp %180 : vector<2x32xf32>
    %cst_38 = arith.constant 1.000000e+00 : f32
    %182 = vector.broadcast %cst_38 : f32 to vector<2x32xf32>
    %183 = arith.addf %182, %181 : vector<2x32xf32>
    %184 = arith.divf %182, %183 : vector<2x32xf32>
    %185 = vector.extract_strided_slice %165 {offsets = [0, 64], sizes = [2, 32], strides = [1, 1]} : vector<2x96xf32> to vector<2x32xf32>
    %186 = vector.extract_strided_slice %168 {offsets = [0, 64], sizes = [2, 32], strides = [1, 1]} : vector<2x96xf32> to vector<2x32xf32>
    %187 = arith.mulf %176, %186 : vector<2x32xf32>
    %188 = arith.addf %185, %187 : vector<2x32xf32>
    %189 = math.tanh %188 : vector<2x32xf32>
    %cst_39 = arith.constant 1.000000e+00 : f32
    %190 = vector.broadcast %cst_39 : f32 to vector<2x32xf32>
    %191 = arith.subf %190, %184 : vector<2x32xf32>
    %192 = arith.mulf %191, %189 : vector<2x32xf32>
    %193 = arith.mulf %184, %162 : vector<2x32xf32>
    %194 = arith.addf %192, %193 : vector<2x32xf32>
    %c6_i32 = arith.constant 6 : i32
    %195 = arith.index_cast %c6_i32 : i32 to index
    %c0_40 = arith.constant 0 : index
    %c0_41 = arith.constant 0 : index
    %196 = vector.load %arg0[%195, %c0_40, %c0_41] : memref<8x2x96xf32, #tpu.memory_space<vmem>>, vector<1x2x96xf32>
    %197 = vector.shape_cast %196 : vector<1x2x96xf32> to vector<2x96xf32>
    %cst_42 = arith.constant dense<0.000000e+00> : vector<2x96xf32>
    %198 = tpu.matmul %194, %0, %cst_42 {dimension_numbers = #tpu.dot_dimension_numbers<[1], [0], [0], [1], [0, 0, 1, 1], [], []>} : vector<2x32xf32>, vector<32x96xf32>, vector<2x96xf32> -> vector<2x96xf32>
    %199 = vector.broadcast %1 : vector<1x96xf32> to vector<2x96xf32>
    %200 = arith.addf %198, %199 : vector<2x96xf32>
    %201 = vector.extract_strided_slice %197 {offsets = [0, 0], sizes = [2, 32], strides = [1, 1]} : vector<2x96xf32> to vector<2x32xf32>
    %202 = vector.extract_strided_slice %200 {offsets = [0, 0], sizes = [2, 32], strides = [1, 1]} : vector<2x96xf32> to vector<2x32xf32>
    %203 = arith.addf %201, %202 : vector<2x32xf32>
    %204 = arith.negf %203 : vector<2x32xf32>
    %205 = math.exp %204 : vector<2x32xf32>
    %cst_43 = arith.constant 1.000000e+00 : f32
    %206 = vector.broadcast %cst_43 : f32 to vector<2x32xf32>
    %207 = arith.addf %206, %205 : vector<2x32xf32>
    %208 = arith.divf %206, %207 : vector<2x32xf32>
    %209 = vector.extract_strided_slice %197 {offsets = [0, 32], sizes = [2, 32], strides = [1, 1]} : vector<2x96xf32> to vector<2x32xf32>
    %210 = vector.extract_strided_slice %200 {offsets = [0, 32], sizes = [2, 32], strides = [1, 1]} : vector<2x96xf32> to vector<2x32xf32>
    %211 = arith.addf %209, %210 : vector<2x32xf32>
    %212 = arith.negf %211 : vector<2x32xf32>
    %213 = math.exp %212 : vector<2x32xf32>
    %cst_44 = arith.constant 1.000000e+00 : f32
    %214 = vector.broadcast %cst_44 : f32 to vector<2x32xf32>
    %215 = arith.addf %214, %213 : vector<2x32xf32>
    %216 = arith.divf %214, %215 : vector<2x32xf32>
    %217 = vector.extract_strided_slice %197 {offsets = [0, 64], sizes = [2, 32], strides = [1, 1]} : vector<2x96xf32> to vector<2x32xf32>
    %218 = vector.extract_strided_slice %200 {offsets = [0, 64], sizes = [2, 32], strides = [1, 1]} : vector<2x96xf32> to vector<2x32xf32>
    %219 = arith.mulf %208, %218 : vector<2x32xf32>
    %220 = arith.addf %217, %219 : vector<2x32xf32>
    %221 = math.tanh %220 : vector<2x32xf32>
    %cst_45 = arith.constant 1.000000e+00 : f32
    %222 = vector.broadcast %cst_45 : f32 to vector<2x32xf32>
    %223 = arith.subf %222, %216 : vector<2x32xf32>
    %224 = arith.mulf %223, %221 : vector<2x32xf32>
    %225 = arith.mulf %216, %194 : vector<2x32xf32>
    %226 = arith.addf %224, %225 : vector<2x32xf32>
    %c7_i32 = arith.constant 7 : i32
    %227 = arith.index_cast %c7_i32 : i32 to index
    %c0_46 = arith.constant 0 : index
    %c0_47 = arith.constant 0 : index
    %228 = vector.load %arg0[%227, %c0_46, %c0_47] : memref<8x2x96xf32, #tpu.memory_space<vmem>>, vector<1x2x96xf32>
    %229 = vector.shape_cast %228 : vector<1x2x96xf32> to vector<2x96xf32>
    %cst_48 = arith.constant dense<0.000000e+00> : vector<2x96xf32>
    %230 = tpu.matmul %226, %0, %cst_48 {dimension_numbers = #tpu.dot_dimension_numbers<[1], [0], [0], [1], [0, 0, 1, 1], [], []>} : vector<2x32xf32>, vector<32x96xf32>, vector<2x96xf32> -> vector<2x96xf32>
    %231 = vector.broadcast %1 : vector<1x96xf32> to vector<2x96xf32>
    %232 = arith.addf %230, %231 : vector<2x96xf32>
    %233 = vector.extract_strided_slice %229 {offsets = [0, 0], sizes = [2, 32], strides = [1, 1]} : vector<2x96xf32> to vector<2x32xf32>
    %234 = vector.extract_strided_slice %232 {offsets = [0, 0], sizes = [2, 32], strides = [1, 1]} : vector<2x96xf32> to vector<2x32xf32>
    %235 = arith.addf %233, %234 : vector<2x32xf32>
    %236 = arith.negf %235 : vector<2x32xf32>
    %237 = math.exp %236 : vector<2x32xf32>
    %cst_49 = arith.constant 1.000000e+00 : f32
    %238 = vector.broadcast %cst_49 : f32 to vector<2x32xf32>
    %239 = arith.addf %238, %237 : vector<2x32xf32>
    %240 = arith.divf %238, %239 : vector<2x32xf32>
    %241 = vector.extract_strided_slice %229 {offsets = [0, 32], sizes = [2, 32], strides = [1, 1]} : vector<2x96xf32> to vector<2x32xf32>
    %242 = vector.extract_strided_slice %232 {offsets = [0, 32], sizes = [2, 32], strides = [1, 1]} : vector<2x96xf32> to vector<2x32xf32>
    %243 = arith.addf %241, %242 : vector<2x32xf32>
    %244 = arith.negf %243 : vector<2x32xf32>
    %245 = math.exp %244 : vector<2x32xf32>
    %cst_50 = arith.constant 1.000000e+00 : f32
    %246 = vector.broadcast %cst_50 : f32 to vector<2x32xf32>
    %247 = arith.addf %246, %245 : vector<2x32xf32>
    %248 = arith.divf %246, %247 : vector<2x32xf32>
    %249 = vector.extract_strided_slice %229 {offsets = [0, 64], sizes = [2, 32], strides = [1, 1]} : vector<2x96xf32> to vector<2x32xf32>
    %250 = vector.extract_strided_slice %232 {offsets = [0, 64], sizes = [2, 32], strides = [1, 1]} : vector<2x96xf32> to vector<2x32xf32>
    %251 = arith.mulf %240, %250 : vector<2x32xf32>
    %252 = arith.addf %249, %251 : vector<2x32xf32>
    %253 = math.tanh %252 : vector<2x32xf32>
    %cst_51 = arith.constant 1.000000e+00 : f32
    %254 = vector.broadcast %cst_51 : f32 to vector<2x32xf32>
    %255 = arith.subf %254, %248 : vector<2x32xf32>
    %256 = arith.mulf %255, %253 : vector<2x32xf32>
    %257 = arith.mulf %248, %226 : vector<2x32xf32>
    %258 = arith.addf %256, %257 : vector<2x32xf32>
    %c8_i32 = arith.constant 8 : i32
    %c0_52 = arith.constant 0 : index
    %c0_53 = arith.constant 0 : index
    %259 = vector.load %arg4[%c0_52, %c0_53] : memref<2x32xf32, #tpu.memory_space<vmem>>, vector<2x32xf32>
    tpu.vector_store %arg4[%c0_52, %c0_53], %258 {strides = array<i32>} : memref<2x32xf32, #tpu.memory_space<vmem>>, vector<2x32xf32>,
    return
  }
}

module attributes {stable_mosaic.version = 11 : i64} {
  func.func @gru_seq_kernel(%arg0: memref<7x2x96xf32, #tpu.memory_space<vmem>>, %arg1: memref<2x96xf32, #tpu.memory_space<vmem>>, %arg2: memref<2x32xf32, #tpu.memory_space<vmem>>, %arg3: memref<32x96xf32, #tpu.memory_space<vmem>>, %arg4: memref<1x96xf32, #tpu.memory_space<vmem>>, %arg5: memref<7x2x32xf32, #tpu.memory_space<vmem>>) attributes {dimension_semantics = [], scalar_prefetch = 0 : i64, scratch_operands = 0 : i64, tpu.core_type = #tpu.core_type<tc>} {
    %c0 = arith.constant 0 : index
    %c0_0 = arith.constant 0 : index
    %0 = vector.load %arg3[%c0, %c0_0] : memref<32x96xf32, #tpu.memory_space<vmem>>, vector<32x96xf32>
    %c0_1 = arith.constant 0 : index
    %c0_2 = arith.constant 0 : index
    %1 = vector.load %arg4[%c0_1, %c0_2] : memref<1x96xf32, #tpu.memory_space<vmem>>, vector<1x96xf32>
    %c0_3 = arith.constant 0 : index
    %c0_4 = arith.constant 0 : index
    %2 = vector.load %arg1[%c0_3, %c0_4] : memref<2x96xf32, #tpu.memory_space<vmem>>, vector<2x96xf32>
    %c0_5 = arith.constant 0 : index
    %c0_6 = arith.constant 0 : index
    %3 = vector.load %arg2[%c0_5, %c0_6] : memref<2x32xf32, #tpu.memory_space<vmem>>, vector<2x32xf32>
    %c0_i32 = arith.constant 0 : i32
    %4 = arith.index_cast %c0_i32 : i32 to index
    %c0_7 = arith.constant 0 : index
    %c0_8 = arith.constant 0 : index
    %5 = vector.load %arg0[%4, %c0_7, %c0_8] : memref<7x2x96xf32, #tpu.memory_space<vmem>>, vector<1x2x96xf32>
    %6 = vector.shape_cast %5 : vector<1x2x96xf32> to vector<2x96xf32>
    %7 = arith.addf %6, %2 : vector<2x96xf32>
    %cst = arith.constant dense<0.000000e+00> : vector<2x96xf32>
    %8 = tpu.matmul %3, %0, %cst {dimension_numbers = #tpu.dot_dimension_numbers<[1], [0], [0], [1], [0, 0, 1, 1], [], []>} : vector<2x32xf32>, vector<32x96xf32>, vector<2x96xf32> -> vector<2x96xf32>
    %9 = vector.broadcast %1 : vector<1x96xf32> to vector<2x96xf32>
    %10 = arith.addf %8, %9 : vector<2x96xf32>
    %11 = vector.extract_strided_slice %7 {offsets = [0, 0], sizes = [2, 32], strides = [1, 1]} : vector<2x96xf32> to vector<2x32xf32>
    %12 = vector.extract_strided_slice %10 {offsets = [0, 0], sizes = [2, 32], strides = [1, 1]} : vector<2x96xf32> to vector<2x32xf32>
    %13 = arith.addf %11, %12 : vector<2x32xf32>
    %14 = arith.negf %13 : vector<2x32xf32>
    %15 = math.exp %14 : vector<2x32xf32>
    %cst_9 = arith.constant 1.000000e+00 : f32
    %16 = vector.broadcast %cst_9 : f32 to vector<2x32xf32>
    %17 = arith.addf %16, %15 : vector<2x32xf32>
    %18 = arith.divf %16, %17 : vector<2x32xf32>
    %19 = vector.extract_strided_slice %7 {offsets = [0, 32], sizes = [2, 32], strides = [1, 1]} : vector<2x96xf32> to vector<2x32xf32>
    %20 = vector.extract_strided_slice %10 {offsets = [0, 32], sizes = [2, 32], strides = [1, 1]} : vector<2x96xf32> to vector<2x32xf32>
    %21 = arith.addf %19, %20 : vector<2x32xf32>
    %22 = arith.negf %21 : vector<2x32xf32>
    %23 = math.exp %22 : vector<2x32xf32>
    %cst_10 = arith.constant 1.000000e+00 : f32
    %24 = vector.broadcast %cst_10 : f32 to vector<2x32xf32>
    %25 = arith.addf %24, %23 : vector<2x32xf32>
    %26 = arith.divf %24, %25 : vector<2x32xf32>
    %27 = vector.extract_strided_slice %7 {offsets = [0, 64], sizes = [2, 32], strides = [1, 1]} : vector<2x96xf32> to vector<2x32xf32>
    %28 = vector.extract_strided_slice %10 {offsets = [0, 64], sizes = [2, 32], strides = [1, 1]} : vector<2x96xf32> to vector<2x32xf32>
    %29 = arith.mulf %18, %28 : vector<2x32xf32>
    %30 = arith.addf %27, %29 : vector<2x32xf32>
    %31 = math.tanh %30 : vector<2x32xf32>
    %cst_11 = arith.constant 1.000000e+00 : f32
    %32 = vector.broadcast %cst_11 : f32 to vector<2x32xf32>
    %33 = arith.subf %32, %26 : vector<2x32xf32>
    %34 = arith.mulf %33, %31 : vector<2x32xf32>
    %35 = arith.mulf %26, %3 : vector<2x32xf32>
    %36 = arith.addf %34, %35 : vector<2x32xf32>
    %37 = arith.index_cast %c0_i32 : i32 to index
    %c0_12 = arith.constant 0 : index
    %c0_13 = arith.constant 0 : index
    %38 = vector.load %arg5[%37, %c0_12, %c0_13] : memref<7x2x32xf32, #tpu.memory_space<vmem>>, vector<1x2x32xf32>
    %39 = vector.shape_cast %38 : vector<1x2x32xf32> to vector<2x32xf32>
    %40 = vector.shape_cast %36 : vector<2x32xf32> to vector<1x2x32xf32>
    tpu.vector_store %arg5[%37, %c0_12, %c0_13], %40 {strides = array<i32>} : memref<7x2x32xf32, #tpu.memory_space<vmem>>, vector<1x2x32xf32>,
    %c1_i32 = arith.constant 1 : i32
    %41 = arith.index_cast %c1_i32 : i32 to index
    %c0_14 = arith.constant 0 : index
    %c0_15 = arith.constant 0 : index
    %42 = vector.load %arg0[%41, %c0_14, %c0_15] : memref<7x2x96xf32, #tpu.memory_space<vmem>>, vector<1x2x96xf32>
    %43 = vector.shape_cast %42 : vector<1x2x96xf32> to vector<2x96xf32>
    %44 = arith.addf %43, %2 : vector<2x96xf32>
    %cst_16 = arith.constant dense<0.000000e+00> : vector<2x96xf32>
    %45 = tpu.matmul %36, %0, %cst_16 {dimension_numbers = #tpu.dot_dimension_numbers<[1], [0], [0], [1], [0, 0, 1, 1], [], []>} : vector<2x32xf32>, vector<32x96xf32>, vector<2x96xf32> -> vector<2x96xf32>
    %46 = vector.broadcast %1 : vector<1x96xf32> to vector<2x96xf32>
    %47 = arith.addf %45, %46 : vector<2x96xf32>
    %48 = vector.extract_strided_slice %44 {offsets = [0, 0], sizes = [2, 32], strides = [1, 1]} : vector<2x96xf32> to vector<2x32xf32>
    %49 = vector.extract_strided_slice %47 {offsets = [0, 0], sizes = [2, 32], strides = [1, 1]} : vector<2x96xf32> to vector<2x32xf32>
    %50 = arith.addf %48, %49 : vector<2x32xf32>
    %51 = arith.negf %50 : vector<2x32xf32>
    %52 = math.exp %51 : vector<2x32xf32>
    %cst_17 = arith.constant 1.000000e+00 : f32
    %53 = vector.broadcast %cst_17 : f32 to vector<2x32xf32>
    %54 = arith.addf %53, %52 : vector<2x32xf32>
    %55 = arith.divf %53, %54 : vector<2x32xf32>
    %56 = vector.extract_strided_slice %44 {offsets = [0, 32], sizes = [2, 32], strides = [1, 1]} : vector<2x96xf32> to vector<2x32xf32>
    %57 = vector.extract_strided_slice %47 {offsets = [0, 32], sizes = [2, 32], strides = [1, 1]} : vector<2x96xf32> to vector<2x32xf32>
    %58 = arith.addf %56, %57 : vector<2x32xf32>
    %59 = arith.negf %58 : vector<2x32xf32>
    %60 = math.exp %59 : vector<2x32xf32>
    %cst_18 = arith.constant 1.000000e+00 : f32
    %61 = vector.broadcast %cst_18 : f32 to vector<2x32xf32>
    %62 = arith.addf %61, %60 : vector<2x32xf32>
    %63 = arith.divf %61, %62 : vector<2x32xf32>
    %64 = vector.extract_strided_slice %44 {offsets = [0, 64], sizes = [2, 32], strides = [1, 1]} : vector<2x96xf32> to vector<2x32xf32>
    %65 = vector.extract_strided_slice %47 {offsets = [0, 64], sizes = [2, 32], strides = [1, 1]} : vector<2x96xf32> to vector<2x32xf32>
    %66 = arith.mulf %55, %65 : vector<2x32xf32>
    %67 = arith.addf %64, %66 : vector<2x32xf32>
    %68 = math.tanh %67 : vector<2x32xf32>
    %cst_19 = arith.constant 1.000000e+00 : f32
    %69 = vector.broadcast %cst_19 : f32 to vector<2x32xf32>
    %70 = arith.subf %69, %63 : vector<2x32xf32>
    %71 = arith.mulf %70, %68 : vector<2x32xf32>
    %72 = arith.mulf %63, %36 : vector<2x32xf32>
    %73 = arith.addf %71, %72 : vector<2x32xf32>
    %74 = arith.index_cast %c1_i32 : i32 to index
    %c0_20 = arith.constant 0 : index
    %c0_21 = arith.constant 0 : index
    %75 = vector.load %arg5[%74, %c0_20, %c0_21] : memref<7x2x32xf32, #tpu.memory_space<vmem>>, vector<1x2x32xf32>
    %76 = vector.shape_cast %75 : vector<1x2x32xf32> to vector<2x32xf32>
    %77 = vector.shape_cast %73 : vector<2x32xf32> to vector<1x2x32xf32>
    tpu.vector_store %arg5[%74, %c0_20, %c0_21], %77 {strides = array<i32>} : memref<7x2x32xf32, #tpu.memory_space<vmem>>, vector<1x2x32xf32>,
    %c2_i32 = arith.constant 2 : i32
    %78 = arith.index_cast %c2_i32 : i32 to index
    %c0_22 = arith.constant 0 : index
    %c0_23 = arith.constant 0 : index
    %79 = vector.load %arg0[%78, %c0_22, %c0_23] : memref<7x2x96xf32, #tpu.memory_space<vmem>>, vector<1x2x96xf32>
    %80 = vector.shape_cast %79 : vector<1x2x96xf32> to vector<2x96xf32>
    %81 = arith.addf %80, %2 : vector<2x96xf32>
    %cst_24 = arith.constant dense<0.000000e+00> : vector<2x96xf32>
    %82 = tpu.matmul %73, %0, %cst_24 {dimension_numbers = #tpu.dot_dimension_numbers<[1], [0], [0], [1], [0, 0, 1, 1], [], []>} : vector<2x32xf32>, vector<32x96xf32>, vector<2x96xf32> -> vector<2x96xf32>
    %83 = vector.broadcast %1 : vector<1x96xf32> to vector<2x96xf32>
    %84 = arith.addf %82, %83 : vector<2x96xf32>
    %85 = vector.extract_strided_slice %81 {offsets = [0, 0], sizes = [2, 32], strides = [1, 1]} : vector<2x96xf32> to vector<2x32xf32>
    %86 = vector.extract_strided_slice %84 {offsets = [0, 0], sizes = [2, 32], strides = [1, 1]} : vector<2x96xf32> to vector<2x32xf32>
    %87 = arith.addf %85, %86 : vector<2x32xf32>
    %88 = arith.negf %87 : vector<2x32xf32>
    %89 = math.exp %88 : vector<2x32xf32>
    %cst_25 = arith.constant 1.000000e+00 : f32
    %90 = vector.broadcast %cst_25 : f32 to vector<2x32xf32>
    %91 = arith.addf %90, %89 : vector<2x32xf32>
    %92 = arith.divf %90, %91 : vector<2x32xf32>
    %93 = vector.extract_strided_slice %81 {offsets = [0, 32], sizes = [2, 32], strides = [1, 1]} : vector<2x96xf32> to vector<2x32xf32>
    %94 = vector.extract_strided_slice %84 {offsets = [0, 32], sizes = [2, 32], strides = [1, 1]} : vector<2x96xf32> to vector<2x32xf32>
    %95 = arith.addf %93, %94 : vector<2x32xf32>
    %96 = arith.negf %95 : vector<2x32xf32>
    %97 = math.exp %96 : vector<2x32xf32>
    %cst_26 = arith.constant 1.000000e+00 : f32
    %98 = vector.broadcast %cst_26 : f32 to vector<2x32xf32>
    %99 = arith.addf %98, %97 : vector<2x32xf32>
    %100 = arith.divf %98, %99 : vector<2x32xf32>
    %101 = vector.extract_strided_slice %81 {offsets = [0, 64], sizes = [2, 32], strides = [1, 1]} : vector<2x96xf32> to vector<2x32xf32>
    %102 = vector.extract_strided_slice %84 {offsets = [0, 64], sizes = [2, 32], strides = [1, 1]} : vector<2x96xf32> to vector<2x32xf32>
    %103 = arith.mulf %92, %102 : vector<2x32xf32>
    %104 = arith.addf %101, %103 : vector<2x32xf32>
    %105 = math.tanh %104 : vector<2x32xf32>
    %cst_27 = arith.constant 1.000000e+00 : f32
    %106 = vector.broadcast %cst_27 : f32 to vector<2x32xf32>
    %107 = arith.subf %106, %100 : vector<2x32xf32>
    %108 = arith.mulf %107, %105 : vector<2x32xf32>
    %109 = arith.mulf %100, %73 : vector<2x32xf32>
    %110 = arith.addf %108, %109 : vector<2x32xf32>
    %111 = arith.index_cast %c2_i32 : i32 to index
    %c0_28 = arith.constant 0 : index
    %c0_29 = arith.constant 0 : index
    %112 = vector.load %arg5[%111, %c0_28, %c0_29] : memref<7x2x32xf32, #tpu.memory_space<vmem>>, vector<1x2x32xf32>
    %113 = vector.shape_cast %112 : vector<1x2x32xf32> to vector<2x32xf32>
    %114 = vector.shape_cast %110 : vector<2x32xf32> to vector<1x2x32xf32>
    tpu.vector_store %arg5[%111, %c0_28, %c0_29], %114 {strides = array<i32>} : memref<7x2x32xf32, #tpu.memory_space<vmem>>, vector<1x2x32xf32>,
    %c3_i32 = arith.constant 3 : i32
    %115 = arith.index_cast %c3_i32 : i32 to index
    %c0_30 = arith.constant 0 : index
    %c0_31 = arith.constant 0 : index
    %116 = vector.load %arg0[%115, %c0_30, %c0_31] : memref<7x2x96xf32, #tpu.memory_space<vmem>>, vector<1x2x96xf32>
    %117 = vector.shape_cast %116 : vector<1x2x96xf32> to vector<2x96xf32>
    %118 = arith.addf %117, %2 : vector<2x96xf32>
    %cst_32 = arith.constant dense<0.000000e+00> : vector<2x96xf32>
    %119 = tpu.matmul %110, %0, %cst_32 {dimension_numbers = #tpu.dot_dimension_numbers<[1], [0], [0], [1], [0, 0, 1, 1], [], []>} : vector<2x32xf32>, vector<32x96xf32>, vector<2x96xf32> -> vector<2x96xf32>
    %120 = vector.broadcast %1 : vector<1x96xf32> to vector<2x96xf32>
    %121 = arith.addf %119, %120 : vector<2x96xf32>
    %122 = vector.extract_strided_slice %118 {offsets = [0, 0], sizes = [2, 32], strides = [1, 1]} : vector<2x96xf32> to vector<2x32xf32>
    %123 = vector.extract_strided_slice %121 {offsets = [0, 0], sizes = [2, 32], strides = [1, 1]} : vector<2x96xf32> to vector<2x32xf32>
    %124 = arith.addf %122, %123 : vector<2x32xf32>
    %125 = arith.negf %124 : vector<2x32xf32>
    %126 = math.exp %125 : vector<2x32xf32>
    %cst_33 = arith.constant 1.000000e+00 : f32
    %127 = vector.broadcast %cst_33 : f32 to vector<2x32xf32>
    %128 = arith.addf %127, %126 : vector<2x32xf32>
    %129 = arith.divf %127, %128 : vector<2x32xf32>
    %130 = vector.extract_strided_slice %118 {offsets = [0, 32], sizes = [2, 32], strides = [1, 1]} : vector<2x96xf32> to vector<2x32xf32>
    %131 = vector.extract_strided_slice %121 {offsets = [0, 32], sizes = [2, 32], strides = [1, 1]} : vector<2x96xf32> to vector<2x32xf32>
    %132 = arith.addf %130, %131 : vector<2x32xf32>
    %133 = arith.negf %132 : vector<2x32xf32>
    %134 = math.exp %133 : vector<2x32xf32>
    %cst_34 = arith.constant 1.000000e+00 : f32
    %135 = vector.broadcast %cst_34 : f32 to vector<2x32xf32>
    %136 = arith.addf %135, %134 : vector<2x32xf32>
    %137 = arith.divf %135, %136 : vector<2x32xf32>
    %138 = vector.extract_strided_slice %118 {offsets = [0, 64], sizes = [2, 32], strides = [1, 1]} : vector<2x96xf32> to vector<2x32xf32>
    %139 = vector.extract_strided_slice %121 {offsets = [0, 64], sizes = [2, 32], strides = [1, 1]} : vector<2x96xf32> to vector<2x32xf32>
    %140 = arith.mulf %129, %139 : vector<2x32xf32>
    %141 = arith.addf %138, %140 : vector<2x32xf32>
    %142 = math.tanh %141 : vector<2x32xf32>
    %cst_35 = arith.constant 1.000000e+00 : f32
    %143 = vector.broadcast %cst_35 : f32 to vector<2x32xf32>
    %144 = arith.subf %143, %137 : vector<2x32xf32>
    %145 = arith.mulf %144, %142 : vector<2x32xf32>
    %146 = arith.mulf %137, %110 : vector<2x32xf32>
    %147 = arith.addf %145, %146 : vector<2x32xf32>
    %148 = arith.index_cast %c3_i32 : i32 to index
    %c0_36 = arith.constant 0 : index
    %c0_37 = arith.constant 0 : index
    %149 = vector.load %arg5[%148, %c0_36, %c0_37] : memref<7x2x32xf32, #tpu.memory_space<vmem>>, vector<1x2x32xf32>
    %150 = vector.shape_cast %149 : vector<1x2x32xf32> to vector<2x32xf32>
    %151 = vector.shape_cast %147 : vector<2x32xf32> to vector<1x2x32xf32>
    tpu.vector_store %arg5[%148, %c0_36, %c0_37], %151 {strides = array<i32>} : memref<7x2x32xf32, #tpu.memory_space<vmem>>, vector<1x2x32xf32>,
    %c4_i32 = arith.constant 4 : i32
    %152 = arith.index_cast %c4_i32 : i32 to index
    %c0_38 = arith.constant 0 : index
    %c0_39 = arith.constant 0 : index
    %153 = vector.load %arg0[%152, %c0_38, %c0_39] : memref<7x2x96xf32, #tpu.memory_space<vmem>>, vector<1x2x96xf32>
    %154 = vector.shape_cast %153 : vector<1x2x96xf32> to vector<2x96xf32>
    %155 = arith.addf %154, %2 : vector<2x96xf32>
    %cst_40 = arith.constant dense<0.000000e+00> : vector<2x96xf32>
    %156 = tpu.matmul %147, %0, %cst_40 {dimension_numbers = #tpu.dot_dimension_numbers<[1], [0], [0], [1], [0, 0, 1, 1], [], []>} : vector<2x32xf32>, vector<32x96xf32>, vector<2x96xf32> -> vector<2x96xf32>
    %157 = vector.broadcast %1 : vector<1x96xf32> to vector<2x96xf32>
    %158 = arith.addf %156, %157 : vector<2x96xf32>
    %159 = vector.extract_strided_slice %155 {offsets = [0, 0], sizes = [2, 32], strides = [1, 1]} : vector<2x96xf32> to vector<2x32xf32>
    %160 = vector.extract_strided_slice %158 {offsets = [0, 0], sizes = [2, 32], strides = [1, 1]} : vector<2x96xf32> to vector<2x32xf32>
    %161 = arith.addf %159, %160 : vector<2x32xf32>
    %162 = arith.negf %161 : vector<2x32xf32>
    %163 = math.exp %162 : vector<2x32xf32>
    %cst_41 = arith.constant 1.000000e+00 : f32
    %164 = vector.broadcast %cst_41 : f32 to vector<2x32xf32>
    %165 = arith.addf %164, %163 : vector<2x32xf32>
    %166 = arith.divf %164, %165 : vector<2x32xf32>
    %167 = vector.extract_strided_slice %155 {offsets = [0, 32], sizes = [2, 32], strides = [1, 1]} : vector<2x96xf32> to vector<2x32xf32>
    %168 = vector.extract_strided_slice %158 {offsets = [0, 32], sizes = [2, 32], strides = [1, 1]} : vector<2x96xf32> to vector<2x32xf32>
    %169 = arith.addf %167, %168 : vector<2x32xf32>
    %170 = arith.negf %169 : vector<2x32xf32>
    %171 = math.exp %170 : vector<2x32xf32>
    %cst_42 = arith.constant 1.000000e+00 : f32
    %172 = vector.broadcast %cst_42 : f32 to vector<2x32xf32>
    %173 = arith.addf %172, %171 : vector<2x32xf32>
    %174 = arith.divf %172, %173 : vector<2x32xf32>
    %175 = vector.extract_strided_slice %155 {offsets = [0, 64], sizes = [2, 32], strides = [1, 1]} : vector<2x96xf32> to vector<2x32xf32>
    %176 = vector.extract_strided_slice %158 {offsets = [0, 64], sizes = [2, 32], strides = [1, 1]} : vector<2x96xf32> to vector<2x32xf32>
    %177 = arith.mulf %166, %176 : vector<2x32xf32>
    %178 = arith.addf %175, %177 : vector<2x32xf32>
    %179 = math.tanh %178 : vector<2x32xf32>
    %cst_43 = arith.constant 1.000000e+00 : f32
    %180 = vector.broadcast %cst_43 : f32 to vector<2x32xf32>
    %181 = arith.subf %180, %174 : vector<2x32xf32>
    %182 = arith.mulf %181, %179 : vector<2x32xf32>
    %183 = arith.mulf %174, %147 : vector<2x32xf32>
    %184 = arith.addf %182, %183 : vector<2x32xf32>
    %185 = arith.index_cast %c4_i32 : i32 to index
    %c0_44 = arith.constant 0 : index
    %c0_45 = arith.constant 0 : index
    %186 = vector.load %arg5[%185, %c0_44, %c0_45] : memref<7x2x32xf32, #tpu.memory_space<vmem>>, vector<1x2x32xf32>
    %187 = vector.shape_cast %186 : vector<1x2x32xf32> to vector<2x32xf32>
    %188 = vector.shape_cast %184 : vector<2x32xf32> to vector<1x2x32xf32>
    tpu.vector_store %arg5[%185, %c0_44, %c0_45], %188 {strides = array<i32>} : memref<7x2x32xf32, #tpu.memory_space<vmem>>, vector<1x2x32xf32>,
    %c5_i32 = arith.constant 5 : i32
    %189 = arith.index_cast %c5_i32 : i32 to index
    %c0_46 = arith.constant 0 : index
    %c0_47 = arith.constant 0 : index
    %190 = vector.load %arg0[%189, %c0_46, %c0_47] : memref<7x2x96xf32, #tpu.memory_space<vmem>>, vector<1x2x96xf32>
    %191 = vector.shape_cast %190 : vector<1x2x96xf32> to vector<2x96xf32>
    %192 = arith.addf %191, %2 : vector<2x96xf32>
    %cst_48 = arith.constant dense<0.000000e+00> : vector<2x96xf32>
    %193 = tpu.matmul %184, %0, %cst_48 {dimension_numbers = #tpu.dot_dimension_numbers<[1], [0], [0], [1], [0, 0, 1, 1], [], []>} : vector<2x32xf32>, vector<32x96xf32>, vector<2x96xf32> -> vector<2x96xf32>
    %194 = vector.broadcast %1 : vector<1x96xf32> to vector<2x96xf32>
    %195 = arith.addf %193, %194 : vector<2x96xf32>
    %196 = vector.extract_strided_slice %192 {offsets = [0, 0], sizes = [2, 32], strides = [1, 1]} : vector<2x96xf32> to vector<2x32xf32>
    %197 = vector.extract_strided_slice %195 {offsets = [0, 0], sizes = [2, 32], strides = [1, 1]} : vector<2x96xf32> to vector<2x32xf32>
    %198 = arith.addf %196, %197 : vector<2x32xf32>
    %199 = arith.negf %198 : vector<2x32xf32>
    %200 = math.exp %199 : vector<2x32xf32>
    %cst_49 = arith.constant 1.000000e+00 : f32
    %201 = vector.broadcast %cst_49 : f32 to vector<2x32xf32>
    %202 = arith.addf %201, %200 : vector<2x32xf32>
    %203 = arith.divf %201, %202 : vector<2x32xf32>
    %204 = vector.extract_strided_slice %192 {offsets = [0, 32], sizes = [2, 32], strides = [1, 1]} : vector<2x96xf32> to vector<2x32xf32>
    %205 = vector.extract_strided_slice %195 {offsets = [0, 32], sizes = [2, 32], strides = [1, 1]} : vector<2x96xf32> to vector<2x32xf32>
    %206 = arith.addf %204, %205 : vector<2x32xf32>
    %207 = arith.negf %206 : vector<2x32xf32>
    %208 = math.exp %207 : vector<2x32xf32>
    %cst_50 = arith.constant 1.000000e+00 : f32
    %209 = vector.broadcast %cst_50 : f32 to vector<2x32xf32>
    %210 = arith.addf %209, %208 : vector<2x32xf32>
    %211 = arith.divf %209, %210 : vector<2x32xf32>
    %212 = vector.extract_strided_slice %192 {offsets = [0, 64], sizes = [2, 32], strides = [1, 1]} : vector<2x96xf32> to vector<2x32xf32>
    %213 = vector.extract_strided_slice %195 {offsets = [0, 64], sizes = [2, 32], strides = [1, 1]} : vector<2x96xf32> to vector<2x32xf32>
    %214 = arith.mulf %203, %213 : vector<2x32xf32>
    %215 = arith.addf %212, %214 : vector<2x32xf32>
    %216 = math.tanh %215 : vector<2x32xf32>
    %cst_51 = arith.constant 1.000000e+00 : f32
    %217 = vector.broadcast %cst_51 : f32 to vector<2x32xf32>
    %218 = arith.subf %217, %211 : vector<2x32xf32>
    %219 = arith.mulf %218, %216 : vector<2x32xf32>
    %220 = arith.mulf %211, %184 : vector<2x32xf32>
    %221 = arith.addf %219, %220 : vector<2x32xf32>
    %222 = arith.index_cast %c5_i32 : i32 to index
    %c0_52 = arith.constant 0 : index
    %c0_53 = arith.constant 0 : index
    %223 = vector.load %arg5[%222, %c0_52, %c0_53] : memref<7x2x32xf32, #tpu.memory_space<vmem>>, vector<1x2x32xf32>
    %224 = vector.shape_cast %223 : vector<1x2x32xf32> to vector<2x32xf32>
    %225 = vector.shape_cast %221 : vector<2x32xf32> to vector<1x2x32xf32>
    tpu.vector_store %arg5[%222, %c0_52, %c0_53], %225 {strides = array<i32>} : memref<7x2x32xf32, #tpu.memory_space<vmem>>, vector<1x2x32xf32>,
    %c6_i32 = arith.constant 6 : i32
    %226 = arith.index_cast %c6_i32 : i32 to index
    %c0_54 = arith.constant 0 : index
    %c0_55 = arith.constant 0 : index
    %227 = vector.load %arg0[%226, %c0_54, %c0_55] : memref<7x2x96xf32, #tpu.memory_space<vmem>>, vector<1x2x96xf32>
    %228 = vector.shape_cast %227 : vector<1x2x96xf32> to vector<2x96xf32>
    %229 = arith.addf %228, %2 : vector<2x96xf32>
    %cst_56 = arith.constant dense<0.000000e+00> : vector<2x96xf32>
    %230 = tpu.matmul %221, %0, %cst_56 {dimension_numbers = #tpu.dot_dimension_numbers<[1], [0], [0], [1], [0, 0, 1, 1], [], []>} : vector<2x32xf32>, vector<32x96xf32>, vector<2x96xf32> -> vector<2x96xf32>
    %231 = vector.broadcast %1 : vector<1x96xf32> to vector<2x96xf32>
    %232 = arith.addf %230, %231 : vector<2x96xf32>
    %233 = vector.extract_strided_slice %229 {offsets = [0, 0], sizes = [2, 32], strides = [1, 1]} : vector<2x96xf32> to vector<2x32xf32>
    %234 = vector.extract_strided_slice %232 {offsets = [0, 0], sizes = [2, 32], strides = [1, 1]} : vector<2x96xf32> to vector<2x32xf32>
    %235 = arith.addf %233, %234 : vector<2x32xf32>
    %236 = arith.negf %235 : vector<2x32xf32>
    %237 = math.exp %236 : vector<2x32xf32>
    %cst_57 = arith.constant 1.000000e+00 : f32
    %238 = vector.broadcast %cst_57 : f32 to vector<2x32xf32>
    %239 = arith.addf %238, %237 : vector<2x32xf32>
    %240 = arith.divf %238, %239 : vector<2x32xf32>
    %241 = vector.extract_strided_slice %229 {offsets = [0, 32], sizes = [2, 32], strides = [1, 1]} : vector<2x96xf32> to vector<2x32xf32>
    %242 = vector.extract_strided_slice %232 {offsets = [0, 32], sizes = [2, 32], strides = [1, 1]} : vector<2x96xf32> to vector<2x32xf32>
    %243 = arith.addf %241, %242 : vector<2x32xf32>
    %244 = arith.negf %243 : vector<2x32xf32>
    %245 = math.exp %244 : vector<2x32xf32>
    %cst_58 = arith.constant 1.000000e+00 : f32
    %246 = vector.broadcast %cst_58 : f32 to vector<2x32xf32>
    %247 = arith.addf %246, %245 : vector<2x32xf32>
    %248 = arith.divf %246, %247 : vector<2x32xf32>
    %249 = vector.extract_strided_slice %229 {offsets = [0, 64], sizes = [2, 32], strides = [1, 1]} : vector<2x96xf32> to vector<2x32xf32>
    %250 = vector.extract_strided_slice %232 {offsets = [0, 64], sizes = [2, 32], strides = [1, 1]} : vector<2x96xf32> to vector<2x32xf32>
    %251 = arith.mulf %240, %250 : vector<2x32xf32>
    %252 = arith.addf %249, %251 : vector<2x32xf32>
    %253 = math.tanh %252 : vector<2x32xf32>
    %cst_59 = arith.constant 1.000000e+00 : f32
    %254 = vector.broadcast %cst_59 : f32 to vector<2x32xf32>
    %255 = arith.subf %254, %248 : vector<2x32xf32>
    %256 = arith.mulf %255, %253 : vector<2x32xf32>
    %257 = arith.mulf %248, %221 : vector<2x32xf32>
    %258 = arith.addf %256, %257 : vector<2x32xf32>
    %259 = arith.index_cast %c6_i32 : i32 to index
    %c0_60 = arith.constant 0 : index
    %c0_61 = arith.constant 0 : index
    %260 = vector.load %arg5[%259, %c0_60, %c0_61] : memref<7x2x32xf32, #tpu.memory_space<vmem>>, vector<1x2x32xf32>
    %261 = vector.shape_cast %260 : vector<1x2x32xf32> to vector<2x32xf32>
    %262 = vector.shape_cast %258 : vector<2x32xf32> to vector<1x2x32xf32>
    tpu.vector_store %arg5[%259, %c0_60, %c0_61], %262 {strides = array<i32>} : memref<7x2x32xf32, #tpu.memory_space<vmem>>, vector<1x2x32xf32>,
    %c7_i32 = arith.constant 7 : i32
    return
  }
}

module attributes {stable_mosaic.version = 11 : i64} {
  func.func @fc_ce_kernel(%arg0: memref<14x32xf32, #tpu.memory_space<vmem>>, %arg1: memref<32x16xf32, #tpu.memory_space<vmem>>, %arg2: memref<1x16xf32, #tpu.memory_space<vmem>>, %arg3: memref<14x1xi32, #tpu.memory_space<vmem>>, %arg4: memref<1x1xf32, #tpu.memory_space<vmem>>) attributes {dimension_semantics = [], scalar_prefetch = 0 : i64, scratch_operands = 0 : i64, tpu.core_type = #tpu.core_type<tc>} {
    %c0 = arith.constant 0 : index
    %c0_0 = arith.constant 0 : index
    %0 = vector.load %arg0[%c0, %c0_0] : memref<14x32xf32, #tpu.memory_space<vmem>>, vector<14x32xf32>
    %c0_1 = arith.constant 0 : index
    %c0_2 = arith.constant 0 : index
    %1 = vector.load %arg1[%c0_1, %c0_2] : memref<32x16xf32, #tpu.memory_space<vmem>>, vector<32x16xf32>
    %cst = arith.constant dense<0.000000e+00> : vector<14x16xf32>
    %2 = tpu.matmul %0, %1, %cst {dimension_numbers = #tpu.dot_dimension_numbers<[1], [0], [0], [1], [0, 0, 1, 1], [], []>} : vector<14x32xf32>, vector<32x16xf32>, vector<14x16xf32> -> vector<14x16xf32>
    %c0_3 = arith.constant 0 : index
    %c0_4 = arith.constant 0 : index
    %3 = vector.load %arg2[%c0_3, %c0_4] : memref<1x16xf32, #tpu.memory_space<vmem>>, vector<1x16xf32>
    %4 = vector.broadcast %3 : vector<1x16xf32> to vector<14x16xf32>
    %5 = arith.addf %2, %4 : vector<14x16xf32>
    %cst_5 = arith.constant dense<0xFF800000> : vector<14xf32>
    %6 = vector.multi_reduction <maximumf>, %5, %cst_5 [1] : vector<14x16xf32> to vector<14xf32>
    %7 = vector.shape_cast %6 : vector<14xf32> to vector<14x1xf32>
    %8 = vector.broadcast %7 : vector<14x1xf32> to vector<14x16xf32>
    %9 = arith.subf %5, %8 : vector<14x16xf32>
    %10 = math.exp %9 : vector<14x16xf32>
    %cst_6 = arith.constant dense<0.000000e+00> : vector<14xf32>
    %11 = vector.multi_reduction <add>, %10, %cst_6 [1] : vector<14x16xf32> to vector<14xf32>
    %12 = vector.shape_cast %11 : vector<14xf32> to vector<14x1xf32>
    %13 = math.log %12 : vector<14x1xf32>
    %14 = arith.addf %7, %13 : vector<14x1xf32>
    %15 = vector.broadcast %14 : vector<14x1xf32> to vector<14x16xf32>
    %16 = arith.subf %5, %15 : vector<14x16xf32>
    %c0_7 = arith.constant 0 : index
    %c0_8 = arith.constant 0 : index
    %17 = vector.load %arg3[%c0_7, %c0_8] : memref<14x1xi32, #tpu.memory_space<vmem>>, vector<14x1xi32>
    %18 = tpu.iota {dimensions = array<i32: 1>} : vector<14x16xi32>
    %19 = vector.broadcast %17 : vector<14x1xi32> to vector<14x16xi32>
    %20 = arith.cmpi eq, %18, %19 : vector<14x16xi32>
    %cst_9 = arith.constant 0.000000e+00 : f32
    %21 = vector.broadcast %cst_9 : f32 to vector<14x16xf32>
    %22 = arith.select %20, %16, %21 : vector<14x16xi1>, vector<14x16xf32>
    %cst_10 = arith.constant dense<0.000000e+00> : vector<14xf32>
    %23 = vector.multi_reduction <add>, %22, %cst_10 [1] : vector<14x16xf32> to vector<14xf32>
    %24 = vector.shape_cast %23 : vector<14xf32> to vector<14x1xf32>
    %c0_i32 = arith.constant 0 : i32
    %25 = vector.broadcast %c0_i32 : i32 to vector<14x1xi32>
    %26 = arith.cmpi ne, %17, %25 : vector<14x1xi32>
    %27 = arith.extui %26 : vector<14x1xi1> to vector<14x1xi32>
    %28 = arith.sitofp %27 : vector<14x1xi32> to vector<14x1xf32>
    %cst_11 = arith.constant 0.000000e+00 : f32
    %29 = vector.broadcast %cst_11 : f32 to vector<14x1xf32>
    %30 = arith.subf %29, %24 : vector<14x1xf32>
    %31 = arith.mulf %30, %28 : vector<14x1xf32>
    %cst_12 = arith.constant dense<0.000000e+00> : vector<1xf32>
    %32 = vector.multi_reduction <add>, %31, %cst_12 [0] : vector<14x1xf32> to vector<1xf32>
    %33 = vector.shape_cast %32 : vector<1xf32> to vector<1x1xf32>
    %cst_13 = arith.constant dense<0.000000e+00> : vector<1xf32>
    %34 = vector.multi_reduction <add>, %28, %cst_13 [0] : vector<14x1xf32> to vector<1xf32>
    %35 = vector.shape_cast %34 : vector<1xf32> to vector<1x1xf32>
    %cst_14 = arith.constant 1.000000e+00 : f32
    %36 = vector.broadcast %cst_14 : f32 to vector<1x1xf32>
    %37 = arith.maximumf %35, %36 : vector<1x1xf32>
    %38 = arith.divf %33, %37 : vector<1x1xf32>
    %c0_15 = arith.constant 0 : index
    %c0_16 = arith.constant 0 : index
    %39 = vector.load %arg4[%c0_15, %c0_16] : memref<1x1xf32, #tpu.memory_space<vmem>>, vector<1x1xf32>
    tpu.vector_store %arg4[%c0_15, %c0_16], %38 {strides = array<i32>} : memref<1x1xf32, #tpu.memory_space<vmem>>, vector<1x1xf32>,
    return
  }
}

</mosaic_0001>

<bundles_post_ra>
// kernel: vae_forward.9
= control target key start
LH: loop header
LB: loop body
LE: loop exit
PB: predicated region body
PF: predicated region fallthrough
CT: control target
= control target key end

     0   :  { %vm24_vm0 = vcmask 261120   ;;  %vm54_vm1 = vcmask 785408   ;;  %vm56_vm2 = vcmask 783360   ;;  %s116_s1 = inlined_call_operand.vmem [shape: f32[32,96], index: 1, kind: input, shape index: {}]   ;;  %s117_s2 = inlined_call_operand.vmem [shape: f32[1,96], index: 2, kind: input, shape index: {}]   ;;  %s118_s0 = inlined_call_operand.vmem [shape: f32[14,32], index: 0, kind: input, shape index: {}]   ;;  %s119_s3 = inlined_call_operand.vmem [shape: f32[14,96], index: 3, kind: output, shape index: {}]  }
   0x1   :  { %v19_v0 = vld [vmem:[%s116_s1 + $0x18] sm:$0xff]  ;;  %v18_v1 = vld [vmem:[%s116_s1 + $0x10] sm:$0xff]  ;;  %v17_v2 = vld [vmem:[%s116_s1 + $0x8] sm:$0xff] }
   0x2   :  { %43 = vmatpush.msra.mxu0 %v19_v0  ;;  %64 = vmatpush.msra.mxu1 %v19_v0  ;;  %v16_v3 = vld [vmem:[%s116_s1] sm:$0xff]  ;;  %v15_v5 = vld [vmem:[%s118_s0 + $0x8] sm:$0x3f] }
   0x3   :  { %v14_v4 = vld [vmem:[%s118_s0] sm:$0xff] }
   0x4   :  { %44 = vmatpush.msra.mxu0 %v18_v1  ;;  %65 = vmatpush.msra.mxu1 %v18_v1  ;;  %v68_v6 = vld [vmem:[%s117_s2] ss:$0 sm:$0xff] }
   0x6   :  { %45 = vmatpush.msra.mxu0 %v17_v2  ;;  %66 = vmatpush.msra.mxu1 %v17_v2 }
   0x8   :  { %46 = vmatpush.msra.mxu0 %v16_v3  ;;  %67 = vmatpush.msra.mxu1 %v16_v3 }
   0x9   :  { %62 = vmatmul.msk.f32.vlgmr.msra.gmra.mxu0 %vm24_vm0, %v14_v4  ;;  %63 = vmatmul.msk.f32.vlgmr.msra.gmra.mxu1 %vm24_vm0, %v15_v5 }
  0x86   :  { %v48_v7 = vpop.f32.mrf.mxu0  ;;  %v51_v8 = vpop.f32.mrf.mxu1 }
  0x87   :  { %v49_v9 = vadd.f32 %v68_v6, %v48_v7  ;;  %v52_v10 = vadd.f32 %v68_v6, %v51_v8 }
  0x89   :  { %55 = vst.msk [vmem:[%s119_s3] sm:$0xff] %vm54_vm1, %v49_v9 }
  0x8a   :  { %57 = vst.msk [vmem:[%s119_s3 + $0x8] sm:$0x3f] %vm56_vm2, %v52_v10 }

// kernel: vae_forward.6
= control target key start
LH: loop header
LB: loop body
LE: loop exit
PB: predicated region body
PF: predicated region fallthrough
CT: control target
= control target key end

     0   :  { %vm24_vm0 = vcmask 261120   ;;  %vm54_vm1 = vcmask 785408   ;;  %s115_s1 = inlined_call_operand.vmem [shape: f32[32,96], index: 1, kind: input, shape index: {}]   ;;  %s116_s2 = inlined_call_operand.vmem [shape: f32[1,96], index: 2, kind: input, shape index: {}]   ;;  %s117_s0 = inlined_call_operand.vmem [shape: f32[16,32], index: 0, kind: input, shape index: {}]   ;;  %s118_s3 = inlined_call_operand.vmem [shape: f32[16,96], index: 3, kind: output, shape index: {}]  }
   0x1   :  { %v19_v0 = vld [vmem:[%s115_s1 + $0x18] sm:$0xff]  ;;  %v18_v1 = vld [vmem:[%s115_s1 + $0x10] sm:$0xff]  ;;  %v17_v2 = vld [vmem:[%s115_s1 + $0x8] sm:$0xff] }
   0x2   :  { %43 = vmatpush.msra.mxu0 %v19_v0  ;;  %63 = vmatpush.msra.mxu1 %v19_v0  ;;  %v16_v3 = vld [vmem:[%s115_s1] sm:$0xff]  ;;  %v15_v5 = vld [vmem:[%s117_s0 + $0x8] sm:$0xff] }
   0x3   :  { %v14_v4 = vld [vmem:[%s117_s0] sm:$0xff] }
   0x4   :  { %44 = vmatpush.msra.mxu0 %v18_v1  ;;  %64 = vmatpush.msra.mxu1 %v18_v1  ;;  %v67_v6 = vld [vmem:[%s116_s2] ss:$0 sm:$0xff] }
   0x6   :  { %45 = vmatpush.msra.mxu0 %v17_v2  ;;  %65 = vmatpush.msra.mxu1 %v17_v2 }
   0x8   :  { %46 = vmatpush.msra.mxu0 %v16_v3  ;;  %66 = vmatpush.msra.mxu1 %v16_v3 }
   0x9   :  { %61 = vmatmul.msk.f32.vlgmr.msra.gmra.mxu0 %vm24_vm0, %v14_v4  ;;  %62 = vmatmul.msk.f32.vlgmr.msra.gmra.mxu1 %vm24_vm0, %v15_v5 }
  0x86   :  { %v48_v7 = vpop.f32.mrf.mxu0  ;;  %v51_v8 = vpop.f32.mrf.mxu1 }
  0x87   :  { %v49_v9 = vadd.f32 %v67_v6, %v48_v7  ;;  %v52_v10 = vadd.f32 %v67_v6, %v51_v8 }
  0x89   :  { %55 = vst.msk [vmem:[%s118_s3] sm:$0xff] %vm54_vm1, %v49_v9 }
  0x8a   :  { %56 = vst.msk [vmem:[%s118_s3 + $0x8] sm:$0xff] %vm54_vm1, %v52_v10 }

// kernel: vae_forward.8
= control target key start
LH: loop header
LB: loop body
LE: loop exit
PB: predicated region body
PF: predicated region fallthrough
CT: control target
= control target key end

     0   :  { %16 = vsyncpa [#allocation3], 0  ;;  %s282_s21 = smov 16   ;;  %s390_s0 = inlined_call_operand.vmem [shape: f32[2,32], index: 0, kind: input, shape index: {}]   ;;  %s391_s1 = inlined_call_operand.vmem [shape: f32[32,32], index: 1, kind: input, shape index: {}]   ;;  %s392_s2 = inlined_call_operand.vmem [shape: f32[1,32], index: 2, kind: input, shape index: {}]   ;;  %s393_s3 = inlined_call_operand.vmem [shape: f32[2,16], index: 3, kind: input, shape index: {}]   ;;  %s394_s4 = inlined_call_operand.vmem [shape: f32[16,32], index: 4, kind: input, shape index: {}]   ;;  %s395_s5 = inlined_call_operand.vmem [shape: f32[1,32], index: 5, kind: input, shape index: {}]   ;;  %s396_s6 = inlined_call_operand.vmem [shape: f32[16,96], index: 6, kind: input, shape index: {}]   ;;  %s397_s7 = inlined_call_operand.hbm [shape: f32[2,16], index: 7, kind: output, shape index: {0}]   ;;  %s398_s8 = inlined_call_operand.hbm [shape: f32[1,1], index: 8, kind: output, shape index: {1}]   ;;  %s399_s9 = inlined_call_operand.vmem [shape: f32[2,32], index: 9, kind: output, shape index: {2}]   ;;  %s400_s10 = inlined_call_operand.vmem [shape: f32[2,96], index: 10, kind: output, shape index: {3}]  }
   0x1   :  { %v36_v0 = vld [vmem:[%s391_s1 + $0x18] sm:$0xff]  ;;  %v35_v1 = vld [vmem:[%s391_s1 + $0x10] sm:$0xff]  ;;  %v68_v2 = vld [vmem:[%s393_s3] sm:$0x3] }
   0x2   :  { %57 = vmatpush.msra.mxu0 %v36_v0  ;;  %v34_v3 = vld [vmem:[%s391_s1 + $0x8] sm:$0xff]  ;;  %70 = vrot.lane.b32.xlu0 %v68_v2, %s282_s21 }
   0x4   :  { %58 = vmatpush.msra.mxu0 %v35_v1 }
   0x5   :  { %17 = vsyncpa [#allocation5], 0  ;;  %v33_v4 = vld [vmem:[%s391_s1] sm:$0xff]  ;;  %vm41_vm0 = vcmask 261120   ;;  %s283_s1 = smov 112   ;;  %v118_v15 = vld [vmem:[%s394_s4 + $0x8] sm:$0xff] }
   0x6   :  { %59 = vmatpush.msra.mxu0 %v34_v3  ;;  %v32_v5 = vld [vmem:[%s390_s0] sm:$0x3]  ;;  %v150_v16 = vld [vmem:[%s396_s6 + $0x8] sm:$0xff]  ;;  %141 = vmatpush.msra.mxu1 %v118_v15  ;;  %vm123_vm1 = vcmask 130048   ;;  %vm79_vm2 = vcmask 123904   ;;  %s180_s13 = sshll.u32 %s397_s7, 4  ;;  %s181_s13 = int_to_ptr.hbm [resolvable:$true] %s180_s13 }
   0x7   :  { %v222_v6 = vld [vmem:[%s392_s2] ss:$0 sm:$0xff]  ;;  %165 = vmatpush.msra.mxu2 %v150_v16  ;;  %s284_s14 = smov [#allocation2]   ;;  %vm147_vm3 = vcmask 254976   ;;  %vm171_vm4 = vcmask 779264   ;;  %v285_v33 = vmov 2.0  }
   0x8   :  { %60 = vmatpush.msra.mxu0 %v33_v4  ;;  %v117_v17 = vld [vmem:[%s394_s4] sm:$0xff]  ;;  %s178_s15 = sshll.u32 %s284_s14, 4  ;;  %vm99_vm5 = vcmask 1041408   ;;  %s191_s22 = sshll.u32 %s398_s8, 4  ;;  %vm115_vm7 = vcmask 0   ;;  %s179_s15 = int_to_ptr.vmem [resolvable:$true] %s178_s15  ;;  %s192_s22 = int_to_ptr.hbm [resolvable:$true] %s191_s22 }
   0x9   :  { %213 = vmatmul.msk.f32.vlgmr.msra.gmra.mxu0 %vm41_vm0, %v32_v5  ;;  %v149_v18 = vld [vmem:[%s396_s6] sm:$0xff]  ;;  %142 = vmatpush.msra.mxu1 %v117_v17 }
   0xa   :  { %166 = vmatpush.msra.mxu2 %v149_v18  ;;  %v223_v29 = vld [vmem:[%s395_s5] ss:$0 sm:$0xff]  ;;  %s286_s5 = smov [#allocation4]  }
  0x74   :  { %v71_v12 = vpop.permute.xlu0 %70 }
  0x86   :  { %v62_v7 = vpop.f32.mrf.mxu0 }
  0x87   :  { %v63_v8 = vadd.f32 %v222_v6, %v62_v7 }
  0x89   :  { %v83_v9 = vmul.f32 %v63_v8, %v63_v8  ;;  %v65_v10 = vmul.f32 0.5, %v63_v8  ;;  %v81_v19 = vmul.f32 1.442695, %v63_v8 }
  0x8b   :  { %85 = vrot.lane.b32.xlu1 %v83_v9, %s282_s21  ;;  %v66_v11 = vmul.f32 1.442695, %v65_v10 }
  0x8d   :  { %224 = vpow2.f32 %v66_v11 }
  0x8e   :  { %226 = vpow2.f32 %v81_v19 }
  0x8f   :  { %228 = vrcp.f32 %v285_v33 }
  0x93   :  { %v225_v13 = vpop.eup %224 }
  0x94   :  { %v73_v14 = vmul.f32 %v225_v13, %v71_v12  ;;  %v227_v20 = vpop.eup %226 }
  0x95   :  { %v229_v34 = vpop.eup %228 }
  0x96   :  { %75 = vrot.lane.b32.xlu0 %v73_v14, %s283_s1  ;;  %v108_v35 = vmul.f32 2.0, %v229_v34  ;;  %vm112_vm6 = vweird.f32 %v229_v34 }
  0x98   :  { %v109_v38 = vsub.f32 1.0, %v108_v35 }
  0x9a   :  { %v110_v41 = vmul.f32 %v229_v34, %v109_v38 }
  0x9c   :  { %v111_v44 = vadd.f32 %v229_v34, %v110_v41 }
  0x9e   :  { %v113_v47 = vsel %vm112_vm6, %v229_v34, %v111_v44 }
  0xfd   :  { %v86_v21 = vpop.permute.xlu1 %85 }
  0xfe   :  { %v88_v22 = vadd.f32 %v227_v20, %v86_v21 }
 0x100   :  { %v214_v23 = vadd.f32 -1.0, %v88_v22 }
 0x102   :  { %v90_v24 = vsub.f32 %v214_v23, %v63_v8 }
 0x104   :  { %92 = vrot.lane.b32.xlu1 %v90_v24, %s283_s1 }
 0x108   :  { %v76_v25 = vpop.permute.xlu0 %75 }
 0x109   :  { %v78_v26 = vadd.f32 %v76_v25, %v63_v8 }
 0x10b   :  { %215 = vmatmul.msk.f32.vlgmr.msra.gmra.mxu1 %vm123_vm1, %v78_v26  ;;  %216 = vmatmul.msk.f32.vlgmr.msra.gmra.mxu2 %vm123_vm1, %v78_v26  ;;  %80 = vst.msk [vmem:[#allocation2] sm:$0x3] %vm79_vm2, %v78_v26 }
 0x10c   :  { %183 = dma.vmem_to_hbm [thread:$0]  %s179_s15, 32, %s181_s13, [#allocation3]  }
 0x176   :  { %v93_v27 = vpop.permute.xlu1 %92 }
 0x177   :  { %v95_v28 = vsel %vm79_vm2, %v93_v27, 0.0 }
 0x178   :  { %96 = vadd.xlane.f32.xlu2 %v95_v28 }
 0x188   :  { %v144_v30 = vpop.f32.mrf.mxu1 }
 0x189   :  { %v145_v31 = vadd.f32 %v223_v29, %v144_v30 }
 0x18b   :  { %148 = vst.msk [vmem:[%s399_s9] sm:$0x3] %vm147_vm3, %v145_v31  ;;  %s189_s9 = sshll.u32 %s286_s5, 4  ;;  %s190_s9 = int_to_ptr.vmem [resolvable:$true] %s189_s9 }
 0x18e   :  { %v168_v32 = vpop.f32.mrf.mxu2 }
 0x18f   :  { %172 = vst.msk [vmem:[%s400_s10] sm:$0x3] %vm171_vm4, %v168_v32 }
 0x1eb   :  { %v97_v36 = vpop.xlane.xlu2 %96 }
 0x1ec   :  { %v98_v37 = vmul.f32 0.5, %v97_v36 }
 0x1ee   :  { %v100_v39 = vsel %vm99_vm5, %v98_v37, 0.0 }
 0x1ef   :  { %v101_v40 = vrot.slane %v100_v39, 4 }
 0x1f1   :  { %v102_v42 = vadd.f32 %v101_v40, %v100_v39 }
 0x1f3   :  { %v103_v43 = vrot.slane %v102_v42, 2 }
 0x1f5   :  { %v104_v45 = vadd.f32 %v103_v43, %v102_v42 }
 0x1f7   :  { %v105_v46 = vrot.slane %v104_v45, 1 }
 0x1f9   :  { %v106_v48 = vadd.f32 %v105_v46, %v104_v45 }
 0x1fb   :  { %v114_v49 = vmul.f32 %v113_v47, %v106_v48 }
 0x1fd   :  { %116 = vst.msk [vmem:[#allocation4] sm:$0x1] %vm115_vm7, %v114_v49 }
 0x1fe   :  { %194 = dma.vmem_to_hbm [thread:$0]  %s190_s9, 16, %s192_s22, [#allocation5]  }
 0x1ff   :  { %278 = dma.done.wait [#allocation3], 32  }
 0x200   :  { %279 = vsyncadd [#allocation3], 4294967264 }
 0x201   :  { %280 = dma.done.wait [#allocation5], 16  }
 0x202   :  { %281 = vsyncadd [#allocation5], 4294967280 }
 0x203   :  { %211 = vsyncpa [#allocation3], 1 }
 0x204   :  { %212 = vsyncpa [#allocation5], 1 }

// kernel: vae_forward.7
= control target key start
LH: loop header
LB: loop body
LE: loop exit
PB: predicated region body
PF: predicated region fallthrough
CT: control target
= control target key end

     0   :  { %vm27_vm0 = vcmask 261120   ;;  %s640_s25 = smov 64   ;;  %s642_s28 = smov 32   ;;  %s763_s2 = inlined_call_operand.vmem [shape: f32[32,96], index: 2, kind: input, shape index: {}]   ;;  %s764_s3 = inlined_call_operand.vmem [shape: f32[1,96], index: 3, kind: input, shape index: {}]   ;;  %s765_s1 = inlined_call_operand.vmem [shape: f32[2,32], index: 1, kind: input, shape index: {}]   ;;  %s766_s0 = inlined_call_operand.vmem [shape: f32[8,2,96], index: 0, kind: input, shape index: {}]   ;;  %s767_s4 = inlined_call_operand.vmem [shape: f32[2,32], index: 4, kind: output, shape index: {}]  }
   0x1   :  { %v20_v0 = vld [vmem:[%s763_s2 + $0x18] sm:$0xff]  ;;  %v19_v1 = vld [vmem:[%s763_s2 + $0x10] sm:$0xff]  ;;  %v18_v2 = vld [vmem:[%s763_s2 + $0x8] sm:$0xff] }
   0x2   :  { %43 = vmatpush.msra.mxu0 %v20_v0  ;;  %112 = vmatpush.msra.mxu1 %v20_v0  ;;  %v17_v3 = vld [vmem:[%s763_s2] sm:$0xff] }
   0x3   :  { %178 = vmatpush.msra.mxu2 %v20_v0  ;;  %244 = vmatpush.msra.mxu3 %v20_v0  ;;  %v22_v4 = vld [vmem:[%s765_s1] sm:$0x3]  ;;  %v567_v37 = vld [vmem:[%s766_s0 + $0x2] sm:$0x3] }
   0x4   :  { %44 = vmatpush.msra.mxu0 %v19_v1  ;;  %113 = vmatpush.msra.mxu1 %v19_v1  ;;  %v687_v5 = vld [vmem:[%s764_s3] ss:$0 sm:$0xff]  ;;  %s641_s3 = smov 96  }
   0x5   :  { %179 = vmatpush.msra.mxu2 %v19_v1  ;;  %245 = vmatpush.msra.mxu3 %v19_v1  ;;  %v23_v8 = vld [vmem:[%s766_s0] sm:$0x3] }
   0x6   :  { %45 = vmatpush.msra.mxu0 %v18_v2  ;;  %114 = vmatpush.msra.mxu1 %v18_v2 }
   0x7   :  { %180 = vmatpush.msra.mxu2 %v18_v2  ;;  %246 = vmatpush.msra.mxu3 %v18_v2 }
   0x8   :  { %46 = vmatpush.msra.mxu0 %v17_v3  ;;  %115 = vmatpush.msra.mxu1 %v17_v3 }
   0x9   :  { %565 = vmatmul.msk.f32.vlgmr.msra.gmra.mxu0 %vm27_vm0, %v22_v4  ;;  %181 = vmatpush.msra.mxu2 %v17_v3 }
   0xa   :  { %247 = vmatpush.msra.mxu3 %v17_v3  ;;  %310 = vmatpush.msrb.mxu0 %v20_v0 }
   0xb   :  { %376 = vmatpush.msrb.mxu1 %v20_v0  ;;  %442 = vmatpush.msrb.mxu2 %v20_v0 }
   0xc   :  { %311 = vmatpush.msrb.mxu0 %v19_v1  ;;  %508 = vmatpush.msrb.mxu3 %v20_v0 }
   0xd   :  { %377 = vmatpush.msrb.mxu1 %v19_v1  ;;  %443 = vmatpush.msrb.mxu2 %v19_v1 }
   0xe   :  { %312 = vmatpush.msrb.mxu0 %v18_v2  ;;  %509 = vmatpush.msrb.mxu3 %v19_v1  ;;  %v570_v1 = vld [vmem:[%s766_s0 + $0x4] sm:$0x3] }
   0xf   :  { %378 = vmatpush.msrb.mxu1 %v18_v2  ;;  %444 = vmatpush.msrb.mxu2 %v18_v2 }
  0x10   :  { %313 = vmatpush.msrb.mxu0 %v17_v3  ;;  %510 = vmatpush.msrb.mxu3 %v18_v2 }
  0x11   :  { %379 = vmatpush.msrb.mxu1 %v17_v3  ;;  %445 = vmatpush.msrb.mxu2 %v17_v3 }
  0x12   :  { %511 = vmatpush.msrb.mxu3 %v17_v3 }
  0x86   :  { %v48_v6 = vpop.f32.mrf.mxu0 }
  0x87   :  { %v49_v7 = vadd.f32 %v687_v5, %v48_v6 }
  0x89   :  { %72 = vrot.lane.b32.xlu0 %v49_v7, %s640_s25  ;;  %v51_v9 = vadd.f32 %v49_v7, %v23_v8 }
  0x8b   :  { %v566_v10 = vmul.f32 -1.442695, %v51_v9 }
  0x8d   :  { %592 = vpow2.f32 %v566_v10 }
  0x93   :  { %v593_v11 = vpop.eup %592 }
  0x94   :  { %v55_v12 = vadd.f32 1.0, %v593_v11 }
  0x96   :  { %594 = vrcp.f32 %v55_v12  ;;  %v67_v18 = vand.u32 2147483648, %v55_v12  ;;  %vm61_vm2 = vweird.f32 %v55_v12  ;;  %v65_v19 = vand.u32 2147483647, %v55_v12 }
  0x98   :  { %v68_v21 = vor.u32 1.1754944e-38, %v67_v18  ;;  %vm66_vm4 = vcmp.eq.f32.partialorder %v65_v19, 8.507059e+37 }
  0x9c   :  { %v595_v13 = vpop.eup %594 }
  0x9d   :  { %v57_v14 = vmul.f32 %v595_v13, %v55_v12  ;;  %vm62_vm1 = vweird.f32 %v595_v13 }
  0x9e   :  { %vm63_vm3 = vmor %vm61_vm2, %vm62_vm1 }
  0x9f   :  { %v58_v15 = vsub.f32 1.0, %v57_v14 }
  0xa1   :  { %v59_v16 = vmul.f32 %v595_v13, %v58_v15 }
  0xa3   :  { %v60_v17 = vadd.f32 %v595_v13, %v59_v16 }
  0xa5   :  { %v64_v20 = vsel %vm63_vm3, %v595_v13, %v60_v17 }
  0xa6   :  { %v69_v23 = vsel %vm66_vm4, %v68_v21, %v64_v20 }
  0xa7   :  { %v82_v29 = vsub.f32 1.0, %v69_v23 }
  0xfb   :  { %v73_v22 = vpop.permute.xlu0 %72 }
  0xfc   :  { %v75_v24 = vmul.f32 %v73_v22, %v69_v23 }
  0xfe   :  { %77 = vrot.lane.b32.xlu0 %v75_v24, %s640_s25 }
 0x170   :  { %v78_v25 = vpop.permute.xlu0 %77 }
 0x171   :  { %v80_v26 = vadd.f32 %v78_v25, %v23_v8 }
 0x173   :  { %596 = vtanh.f32 %v80_v26 }
 0x179   :  { %v597_v27 = vpop.eup %596 }
 0x17a   :  { %84 = vrot.lane.b32.xlu1 %v597_v27, %s641_s3 }
 0x182   :  { %88 = vrot.lane.b32.xlu1 %v22_v4, %s642_s28 }
 0x1ec   :  { %v85_v28 = vpop.permute.xlu1 %84 }
 0x1ed   :  { %v87_v31 = vmul.f32 %v85_v28, %v82_v29 }
 0x1f4   :  { %v89_v30 = vpop.permute.xlu1 %88 }
 0x1f5   :  { %v91_v32 = vmul.f32 %v89_v30, %v69_v23  ;;  %v573_v30 = vld [vmem:[%s766_s0 + $0x6] sm:$0x3] }
 0x1f7   :  { %v92_v33 = vadd.f32 %v91_v32, %v87_v31 }
 0x1f9   :  { %96 = vrot.lane.b32.xlu2 %v92_v33, %s641_s3 }
 0x253   :  { %v97_v34 = vpop.permute.xlu2 %96 }
 0x254   :  { %568 = vmatmul.msk.f32.vlgmr.msra.gmra.mxu1 %vm27_vm0, %v97_v34 }
 0x2d1   :  { %v117_v35 = vpop.f32.mrf.mxu1 }
 0x2d2   :  { %v118_v36 = vadd.f32 %v687_v5, %v117_v35 }
 0x2d4   :  { %141 = vrot.lane.b32.xlu2 %v118_v36, %s640_s25  ;;  %v120_v38 = vadd.f32 %v567_v37, %v118_v36 }
 0x2d6   :  { %v569_v39 = vmul.f32 -1.442695, %v120_v38 }
 0x2d8   :  { %598 = vpow2.f32 %v569_v39 }
 0x2de   :  { %v599_v40 = vpop.eup %598 }
 0x2df   :  { %v124_v41 = vadd.f32 1.0, %v599_v40 }
 0x2e1   :  { %600 = vrcp.f32 %v124_v41  ;;  %v136_v47 = vand.u32 2147483648, %v124_v41  ;;  %vm130_vm6 = vweird.f32 %v124_v41  ;;  %v134_v48 = vand.u32 2147483647, %v124_v41 }
 0x2e3   :  { %v137_v50 = vor.u32 1.1754944e-38, %v136_v47  ;;  %vm135_vm8 = vcmp.eq.f32.partialorder %v134_v48, 8.507059e+37 }
 0x2e7   :  { %v601_v42 = vpop.eup %600 }
 0x2e8   :  { %v126_v43 = vmul.f32 %v601_v42, %v124_v41  ;;  %vm131_vm5 = vweird.f32 %v601_v42 }
 0x2e9   :  { %vm132_vm7 = vmor %vm130_vm6, %vm131_vm5 }
 0x2ea   :  { %v127_v44 = vsub.f32 1.0, %v126_v43 }
 0x2ec   :  { %v128_v45 = vmul.f32 %v601_v42, %v127_v44 }
 0x2ee   :  { %v129_v46 = vadd.f32 %v601_v42, %v128_v45 }
 0x2f0   :  { %v133_v49 = vsel %vm132_vm7, %v601_v42, %v129_v46 }
 0x2f1   :  { %v138_v52 = vsel %vm135_vm8, %v137_v50, %v133_v49 }
 0x2f2   :  { %v151_v57 = vsub.f32 1.0, %v138_v52  ;;  %v157_v59 = vmul.f32 %v138_v52, %v92_v33 }
 0x32e   :  { %v142_v51 = vpop.permute.xlu2 %141 }
 0x32f   :  { %v144_v53 = vmul.f32 %v142_v51, %v138_v52 }
 0x331   :  { %146 = vrot.lane.b32.xlu0 %v144_v53, %s640_s25 }
 0x3a3   :  { %v147_v54 = vpop.permute.xlu0 %146 }
 0x3a4   :  { %v149_v55 = vadd.f32 %v567_v37, %v147_v54 }
 0x3a6   :  { %602 = vtanh.f32 %v149_v55 }
 0x3ac   :  { %v603_v56 = vpop.eup %602 }
 0x3ad   :  { %153 = vrot.lane.b32.xlu1 %v603_v56, %s641_s3 }
 0x41f   :  { %v154_v58 = vpop.permute.xlu1 %153 }
 0x420   :  { %v156_v60 = vmul.f32 %v154_v58, %v151_v57  ;;  %v576_v58 = vld [vmem:[%s766_s0 + $0x8] sm:$0x3] }
 0x422   :  { %v158_v61 = vadd.f32 %v157_v59, %v156_v60 }
 0x424   :  { %162 = vrot.lane.b32.xlu2 %v158_v61, %s641_s3 }
 0x47e   :  { %v163_v62 = vpop.permute.xlu2 %162 }
 0x47f   :  { %571 = vmatmul.msk.f32.vlgmr.msra.gmra.mxu2 %vm27_vm0, %v163_v62 }
 0x502   :  { %v183_v63 = vpop.f32.mrf.mxu2 }
 0x503   :  { %v184_v0 = vadd.f32 %v687_v5, %v183_v63 }
 0x505   :  { %207 = vrot.lane.b32.xlu0 %v184_v0, %s640_s25  ;;  %v186_v2 = vadd.f32 %v570_v1, %v184_v0 }
 0x507   :  { %v572_v3 = vmul.f32 -1.442695, %v186_v2 }
 0x509   :  { %604 = vpow2.f32 %v572_v3 }
 0x50f   :  { %v605_v4 = vpop.eup %604 }
 0x510   :  { %v190_v6 = vadd.f32 1.0, %v605_v4 }
 0x512   :  { %606 = vrcp.f32 %v190_v6  ;;  %v202_v12 = vand.u32 2147483648, %v190_v6  ;;  %vm196_vm10 = vweird.f32 %v190_v6  ;;  %v200_v13 = vand.u32 2147483647, %v190_v6 }
 0x514   :  { %v203_v15 = vor.u32 1.1754944e-38, %v202_v12  ;;  %vm201_vm12 = vcmp.eq.f32.partialorder %v200_v13, 8.507059e+37 }
 0x518   :  { %v607_v7 = vpop.eup %606 }
 0x519   :  { %v192_v8 = vmul.f32 %v607_v7, %v190_v6  ;;  %vm197_vm9 = vweird.f32 %v607_v7 }
 0x51a   :  { %vm198_vm11 = vmor %vm196_vm10, %vm197_vm9 }
 0x51b   :  { %v193_v9 = vsub.f32 1.0, %v192_v8 }
 0x51d   :  { %v194_v10 = vmul.f32 %v607_v7, %v193_v9 }
 0x51f   :  { %v195_v11 = vadd.f32 %v607_v7, %v194_v10 }
 0x521   :  { %v199_v14 = vsel %vm198_vm11, %v607_v7, %v195_v11 }
 0x522   :  { %v204_v17 = vsel %vm201_vm12, %v203_v15, %v199_v14 }
 0x523   :  { %v217_v22 = vsub.f32 1.0, %v204_v17  ;;  %v223_v24 = vmul.f32 %v204_v17, %v158_v61 }
 0x577   :  { %v208_v16 = vpop.permute.xlu0 %207 }
 0x578   :  { %v210_v18 = vmul.f32 %v208_v16, %v204_v17 }
 0x57a   :  { %212 = vrot.lane.b32.xlu1 %v210_v18, %s640_s25 }
 0x5ec   :  { %v213_v19 = vpop.permute.xlu1 %212 }
 0x5ed   :  { %v215_v20 = vadd.f32 %v570_v1, %v213_v19 }
 0x5ef   :  { %608 = vtanh.f32 %v215_v20 }
 0x5f5   :  { %v609_v21 = vpop.eup %608 }
 0x5f6   :  { %219 = vrot.lane.b32.xlu2 %v609_v21, %s641_s3 }
 0x650   :  { %v220_v23 = vpop.permute.xlu2 %219 }
 0x651   :  { %v222_v25 = vmul.f32 %v220_v23, %v217_v22  ;;  %v579_v23 = vld [vmem:[%s766_s0 + $0xa] sm:$0x3] }
 0x653   :  { %v224_v26 = vadd.f32 %v223_v24, %v222_v25 }
 0x655   :  { %228 = vrot.lane.b32.xlu0 %v224_v26, %s641_s3 }
 0x6c7   :  { %v229_v27 = vpop.permute.xlu0 %228 }
 0x6c8   :  { %574 = vmatmul.msk.f32.vlgmr.msra.gmra.mxu3 %vm27_vm0, %v229_v27 }
 0x74b   :  { %v249_v28 = vpop.f32.mrf.mxu3 }
 0x74c   :  { %v250_v29 = vadd.f32 %v687_v5, %v249_v28 }
 0x74e   :  { %273 = vrot.lane.b32.xlu1 %v250_v29, %s640_s25  ;;  %v252_v31 = vadd.f32 %v573_v30, %v250_v29 }
 0x750   :  { %v575_v32 = vmul.f32 -1.442695, %v252_v31 }
 0x752   :  { %610 = vpow2.f32 %v575_v32 }
 0x758   :  { %v611_v33 = vpop.eup %610 }
 0x759   :  { %v256_v34 = vadd.f32 1.0, %v611_v33 }
 0x75b   :  { %612 = vrcp.f32 %v256_v34  ;;  %v268_v40 = vand.u32 2147483648, %v256_v34  ;;  %vm262_vm14 = vweird.f32 %v256_v34  ;;  %v266_v41 = vand.u32 2147483647, %v256_v34 }
 0x75d   :  { %v269_v43 = vor.u32 1.1754944e-38, %v268_v40  ;;  %vm267_vm1 = vcmp.eq.f32.partialorder %v266_v41, 8.507059e+37 }
 0x761   :  { %v613_v35 = vpop.eup %612 }
 0x762   :  { %v258_v36 = vmul.f32 %v613_v35, %v256_v34  ;;  %vm263_vm13 = vweird.f32 %v613_v35 }
 0x763   :  { %vm264_vm15 = vmor %vm262_vm14, %vm263_vm13 }
 0x764   :  { %v259_v37 = vsub.f32 1.0, %v258_v36 }
 0x766   :  { %v260_v38 = vmul.f32 %v613_v35, %v259_v37 }
 0x768   :  { %v261_v39 = vadd.f32 %v613_v35, %v260_v38 }
 0x76a   :  { %v265_v42 = vsel %vm264_vm15, %v613_v35, %v261_v39 }
 0x76b   :  { %v270_v45 = vsel %vm267_vm1, %v269_v43, %v265_v42 }
 0x76c   :  { %v283_v50 = vsub.f32 1.0, %v270_v45  ;;  %v289_v52 = vmul.f32 %v270_v45, %v224_v26 }
 0x7c0   :  { %v274_v44 = vpop.permute.xlu1 %273 }
 0x7c1   :  { %v276_v46 = vmul.f32 %v274_v44, %v270_v45 }
 0x7c3   :  { %278 = vrot.lane.b32.xlu2 %v276_v46, %s640_s25 }
 0x81d   :  { %v279_v47 = vpop.permute.xlu2 %278 }
 0x81e   :  { %v281_v48 = vadd.f32 %v573_v30, %v279_v47 }
 0x820   :  { %614 = vtanh.f32 %v281_v48 }
 0x826   :  { %v615_v49 = vpop.eup %614 }
 0x827   :  { %285 = vrot.lane.b32.xlu0 %v615_v49, %s641_s3 }
 0x899   :  { %v286_v51 = vpop.permute.xlu0 %285 }
 0x89a   :  { %v288_v53 = vmul.f32 %v286_v51, %v283_v50  ;;  %v582_v51 = vld [vmem:[%s766_s0 + $0xc] sm:$0x3] }
 0x89c   :  { %v290_v54 = vadd.f32 %v289_v52, %v288_v53 }
 0x89e   :  { %294 = vrot.lane.b32.xlu1 %v290_v54, %s641_s3 }
 0x910   :  { %v295_v55 = vpop.permute.xlu1 %294 }
 0x911   :  { %577 = vmatmul.msk.f32.vlgmr.msrb.gmra.mxu0 %vm27_vm0, %v295_v55 }
 0x98e   :  { %v315_v56 = vpop.f32.mrf.mxu0 }
 0x98f   :  { %v316_v57 = vadd.f32 %v687_v5, %v315_v56 }
 0x991   :  { %339 = vrot.lane.b32.xlu2 %v316_v57, %s640_s25  ;;  %v318_v59 = vadd.f32 %v576_v58, %v316_v57 }
 0x993   :  { %v578_v60 = vmul.f32 -1.442695, %v318_v59 }
 0x995   :  { %616 = vpow2.f32 %v578_v60 }
 0x99b   :  { %v617_v61 = vpop.eup %616 }
 0x99c   :  { %v322_v62 = vadd.f32 1.0, %v617_v61 }
 0x99e   :  { %618 = vrcp.f32 %v322_v62  ;;  %v334_v4 = vand.u32 2147483648, %v322_v62  ;;  %vm328_vm3 = vweird.f32 %v322_v62  ;;  %v332_v6 = vand.u32 2147483647, %v322_v62 }
 0x9a0   :  { %v335_v8 = vor.u32 1.1754944e-38, %v334_v4  ;;  %vm333_vm5 = vcmp.eq.f32.partialorder %v332_v6, 8.507059e+37 }
 0x9a4   :  { %v619_v63 = vpop.eup %618 }
 0x9a5   :  { %v324_v0 = vmul.f32 %v619_v63, %v322_v62  ;;  %vm329_vm2 = vweird.f32 %v619_v63 }
 0x9a6   :  { %vm330_vm4 = vmor %vm328_vm3, %vm329_vm2  ;;  %vm559_vm2 = vcmask 254976  }
 0x9a7   :  { %v325_v1 = vsub.f32 1.0, %v324_v0 }
 0x9a9   :  { %v326_v2 = vmul.f32 %v619_v63, %v325_v1 }
 0x9ab   :  { %v327_v3 = vadd.f32 %v619_v63, %v326_v2 }
 0x9ad   :  { %v331_v7 = vsel %vm330_vm4, %v619_v63, %v327_v3 }
 0x9ae   :  { %v336_v10 = vsel %vm333_vm5, %v335_v8, %v331_v7 }
 0x9af   :  { %v349_v15 = vsub.f32 1.0, %v336_v10  ;;  %v355_v17 = vmul.f32 %v336_v10, %v290_v54 }
 0x9eb   :  { %v340_v9 = vpop.permute.xlu2 %339 }
 0x9ec   :  { %v342_v11 = vmul.f32 %v340_v9, %v336_v10 }
 0x9ee   :  { %344 = vrot.lane.b32.xlu0 %v342_v11, %s640_s25 }
 0xa60   :  { %v345_v12 = vpop.permute.xlu0 %344 }
 0xa61   :  { %v347_v13 = vadd.f32 %v576_v58, %v345_v12 }
 0xa63   :  { %620 = vtanh.f32 %v347_v13 }
 0xa69   :  { %v621_v14 = vpop.eup %620 }
 0xa6a   :  { %351 = vrot.lane.b32.xlu1 %v621_v14, %s641_s3 }
 0xadc   :  { %v352_v16 = vpop.permute.xlu1 %351 }
 0xadd   :  { %v354_v18 = vmul.f32 %v352_v16, %v349_v15  ;;  %v585_v16 = vld [vmem:[%s766_s0 + $0xe] sm:$0x3] }
 0xadf   :  { %v356_v19 = vadd.f32 %v355_v17, %v354_v18 }
 0xae1   :  { %360 = vrot.lane.b32.xlu2 %v356_v19, %s641_s3 }
 0xb3b   :  { %v361_v20 = vpop.permute.xlu2 %360 }
 0xb3c   :  { %580 = vmatmul.msk.f32.vlgmr.msrb.gmra.mxu1 %vm27_vm0, %v361_v20 }
 0xbb9   :  { %v381_v21 = vpop.f32.mrf.mxu1 }
 0xbba   :  { %v382_v22 = vadd.f32 %v687_v5, %v381_v21 }
 0xbbc   :  { %405 = vrot.lane.b32.xlu0 %v382_v22, %s640_s25  ;;  %v384_v24 = vadd.f32 %v579_v23, %v382_v22 }
 0xbbe   :  { %v581_v25 = vmul.f32 -1.442695, %v384_v24 }
 0xbc0   :  { %622 = vpow2.f32 %v581_v25 }
 0xbc6   :  { %v623_v26 = vpop.eup %622 }
 0xbc7   :  { %v388_v27 = vadd.f32 1.0, %v623_v26 }
 0xbc9   :  { %624 = vrcp.f32 %v388_v27  ;;  %v400_v33 = vand.u32 2147483648, %v388_v27  ;;  %vm394_vm7 = vweird.f32 %v388_v27  ;;  %v398_v34 = vand.u32 2147483647, %v388_v27 }
 0xbcb   :  { %v401_v36 = vor.u32 1.1754944e-38, %v400_v33  ;;  %vm399_vm9 = vcmp.eq.f32.partialorder %v398_v34, 8.507059e+37 }
 0xbcf   :  { %v625_v28 = vpop.eup %624 }
 0xbd0   :  { %v390_v29 = vmul.f32 %v625_v28, %v388_v27  ;;  %vm395_vm6 = vweird.f32 %v625_v28 }
 0xbd1   :  { %vm396_vm8 = vmor %vm394_vm7, %vm395_vm6 }
 0xbd2   :  { %v391_v30 = vsub.f32 1.0, %v390_v29 }
 0xbd4   :  { %v392_v31 = vmul.f32 %v625_v28, %v391_v30 }
 0xbd6   :  { %v393_v32 = vadd.f32 %v625_v28, %v392_v31 }
 0xbd8   :  { %v397_v35 = vsel %vm396_vm8, %v625_v28, %v393_v32 }
 0xbd9   :  { %v402_v38 = vsel %vm399_vm9, %v401_v36, %v397_v35 }
 0xbda   :  { %v415_v43 = vsub.f32 1.0, %v402_v38  ;;  %v421_v45 = vmul.f32 %v402_v38, %v356_v19 }
 0xc2e   :  { %v406_v37 = vpop.permute.xlu0 %405 }
 0xc2f   :  { %v408_v39 = vmul.f32 %v406_v37, %v402_v38 }
 0xc31   :  { %410 = vrot.lane.b32.xlu1 %v408_v39, %s640_s25 }
 0xca3   :  { %v411_v40 = vpop.permute.xlu1 %410 }
 0xca4   :  { %v413_v41 = vadd.f32 %v579_v23, %v411_v40 }
 0xca6   :  { %626 = vtanh.f32 %v413_v41 }
 0xcac   :  { %v627_v42 = vpop.eup %626 }
 0xcad   :  { %417 = vrot.lane.b32.xlu2 %v627_v42, %s641_s3 }
 0xd07   :  { %v418_v44 = vpop.permute.xlu2 %417 }
 0xd08   :  { %v420_v46 = vmul.f32 %v418_v44, %v415_v43 }
 0xd0a   :  { %v422_v47 = vadd.f32 %v421_v45, %v420_v46 }
 0xd0c   :  { %426 = vrot.lane.b32.xlu0 %v422_v47, %s641_s3 }
 0xd7e   :  { %v427_v48 = vpop.permute.xlu0 %426 }
 0xd7f   :  { %583 = vmatmul.msk.f32.vlgmr.msrb.gmra.mxu2 %vm27_vm0, %v427_v48 }
 0xe02   :  { %v447_v49 = vpop.f32.mrf.mxu2 }
 0xe03   :  { %v448_v50 = vadd.f32 %v687_v5, %v447_v49 }
 0xe05   :  { %471 = vrot.lane.b32.xlu1 %v448_v50, %s640_s25  ;;  %v450_v52 = vadd.f32 %v582_v51, %v448_v50 }
 0xe07   :  { %v584_v53 = vmul.f32 -1.442695, %v450_v52 }
 0xe09   :  { %628 = vpow2.f32 %v584_v53 }
 0xe0f   :  { %v629_v54 = vpop.eup %628 }
 0xe10   :  { %v454_v55 = vadd.f32 1.0, %v629_v54 }
 0xe12   :  { %630 = vrcp.f32 %v454_v55  ;;  %v466_v61 = vand.u32 2147483648, %v454_v55  ;;  %vm460_vm11 = vweird.f32 %v454_v55  ;;  %v464_v62 = vand.u32 2147483647, %v454_v55 }
 0xe14   :  { %v467_v0 = vor.u32 1.1754944e-38, %v466_v61  ;;  %vm465_vm13 = vcmp.eq.f32.partialorder %v464_v62, 8.507059e+37 }
 0xe18   :  { %v631_v56 = vpop.eup %630 }
 0xe19   :  { %v456_v57 = vmul.f32 %v631_v56, %v454_v55  ;;  %vm461_vm10 = vweird.f32 %v631_v56 }
 0xe1a   :  { %vm462_vm12 = vmor %vm460_vm11, %vm461_vm10 }
 0xe1b   :  { %v457_v58 = vsub.f32 1.0, %v456_v57 }
 0xe1d   :  { %v458_v59 = vmul.f32 %v631_v56, %v457_v58 }
 0xe1f   :  { %v459_v60 = vadd.f32 %v631_v56, %v458_v59 }
 0xe21   :  { %v463_v63 = vsel %vm462_vm12, %v631_v56, %v459_v60 }
 0xe22   :  { %v468_v2 = vsel %vm465_vm13, %v467_v0, %v463_v63 }
 0xe23   :  { %v481_v8 = vsub.f32 1.0, %v468_v2  ;;  %v487_v10 = vmul.f32 %v468_v2, %v422_v47 }
 0xe77   :  { %v472_v1 = vpop.permute.xlu1 %471 }
 0xe78   :  { %v474_v3 = vmul.f32 %v472_v1, %v468_v2 }
 0xe7a   :  { %476 = vrot.lane.b32.xlu2 %v474_v3, %s640_s25 }
 0xed4   :  { %v477_v4 = vpop.permute.xlu2 %476 }
 0xed5   :  { %v479_v6 = vadd.f32 %v582_v51, %v477_v4 }
 0xed7   :  { %632 = vtanh.f32 %v479_v6 }
 0xedd   :  { %v633_v7 = vpop.eup %632 }
 0xede   :  { %483 = vrot.lane.b32.xlu0 %v633_v7, %s641_s3 }
 0xf50   :  { %v484_v9 = vpop.permute.xlu0 %483 }
 0xf51   :  { %v486_v11 = vmul.f32 %v484_v9, %v481_v8 }
 0xf53   :  { %v488_v12 = vadd.f32 %v487_v10, %v486_v11 }
 0xf55   :  { %492 = vrot.lane.b32.xlu1 %v488_v12, %s641_s3 }
 0xfc7   :  { %v493_v13 = vpop.permute.xlu1 %492 }
 0xfc8   :  { %586 = vmatmul.msk.f32.vlgmr.msrb.gmra.mxu3 %vm27_vm0, %v493_v13 }
0x104b   :  { %v513_v14 = vpop.f32.mrf.mxu3 }
0x104c   :  { %v514_v15 = vadd.f32 %v687_v5, %v513_v14 }
0x104e   :  { %537 = vrot.lane.b32.xlu2 %v514_v15, %s640_s25  ;;  %v516_v17 = vadd.f32 %v585_v16, %v514_v15 }
0x1050   :  { %v587_v18 = vmul.f32 -1.442695, %v516_v17 }
0x1052   :  { %634 = vpow2.f32 %v587_v18 }
0x1058   :  { %v635_v19 = vpop.eup %634 }
0x1059   :  { %v520_v20 = vadd.f32 1.0, %v635_v19 }
0x105b   :  { %636 = vrcp.f32 %v520_v20  ;;  %v532_v26 = vand.u32 2147483648, %v520_v20  ;;  %vm526_vm14 = vweird.f32 %v520_v20  ;;  %v530_v5 = vand.u32 2147483647, %v520_v20 }
0x105d   :  { %v533_v28 = vor.u32 1.1754944e-38, %v532_v26  ;;  %vm531_vm1 = vcmp.eq.f32.partialorder %v530_v5, 8.507059e+37 }
0x1061   :  { %v637_v21 = vpop.eup %636 }
0x1062   :  { %v522_v22 = vmul.f32 %v637_v21, %v520_v20  ;;  %vm527_vm0 = vweird.f32 %v637_v21 }
0x1063   :  { %vm528_vm15 = vmor %vm526_vm14, %vm527_vm0 }
0x1064   :  { %v523_v23 = vsub.f32 1.0, %v522_v22 }
0x1066   :  { %v524_v24 = vmul.f32 %v637_v21, %v523_v23 }
0x1068   :  { %v525_v25 = vadd.f32 %v637_v21, %v524_v24 }
0x106a   :  { %v529_v27 = vsel %vm528_vm15, %v637_v21, %v525_v25 }
0x106b   :  { %v534_v30 = vsel %vm531_vm1, %v533_v28, %v529_v27 }
0x106c   :  { %v547_v35 = vsub.f32 1.0, %v534_v30  ;;  %v553_v37 = vmul.f32 %v534_v30, %v488_v12 }
0x10a8   :  { %v538_v29 = vpop.permute.xlu2 %537 }
0x10a9   :  { %v540_v31 = vmul.f32 %v538_v29, %v534_v30 }
0x10ab   :  { %542 = vrot.lane.b32.xlu0 %v540_v31, %s640_s25 }
0x111d   :  { %v543_v32 = vpop.permute.xlu0 %542 }
0x111e   :  { %v545_v33 = vadd.f32 %v585_v16, %v543_v32 }
0x1120   :  { %638 = vtanh.f32 %v545_v33 }
0x1126   :  { %v639_v34 = vpop.eup %638 }
0x1127   :  { %549 = vrot.lane.b32.xlu1 %v639_v34, %s641_s3 }
0x1199   :  { %v550_v36 = vpop.permute.xlu1 %549 }
0x119a   :  { %v552_v38 = vmul.f32 %v550_v36, %v547_v35 }
0x119c   :  { %v554_v39 = vadd.f32 %v553_v37, %v552_v38 }
0x119e   :  { %556 = vrot.lane.b32.xlu2 %v554_v39, %s641_s3 }
0x11f8   :  { %v557_v40 = vpop.permute.xlu2 %556 }
0x11f9   :  { %560 = vst.msk [vmem:[%s767_s4] sm:$0x3] %vm559_vm2, %v557_v40 }

// kernel: vae_forward.10
= control target key start
LH: loop header
LB: loop body
LE: loop exit
PB: predicated region body
PF: predicated region fallthrough
CT: control target
= control target key end

     0   :  { %vm32_vm0 = vcmask 261120   ;;  %s600_s28 = smov 64   ;;  %vm102_vm5 = vcmask 254976   ;;  %s756_s3 = inlined_call_operand.vmem [shape: f32[32,96], index: 3, kind: input, shape index: {}]   ;;  %s757_s4 = inlined_call_operand.vmem [shape: f32[1,96], index: 4, kind: input, shape index: {}]   ;;  %s758_s2 = inlined_call_operand.vmem [shape: f32[2,32], index: 2, kind: input, shape index: {}]   ;;  %s759_s0 = inlined_call_operand.vmem [shape: f32[7,2,96], index: 0, kind: input, shape index: {}]   ;;  %s760_s1 = inlined_call_operand.vmem [shape: f32[2,96], index: 1, kind: input, shape index: {}]   ;;  %s761_s5 = inlined_call_operand.vmem [shape: f32[7,2,32], index: 5, kind: output, shape index: {}]  }
   0x1   :  { %v23_v0 = vld [vmem:[%s756_s3 + $0x18] sm:$0xff]  ;;  %v22_v1 = vld [vmem:[%s756_s3 + $0x10] sm:$0xff]  ;;  %v21_v2 = vld [vmem:[%s756_s3 + $0x8] sm:$0xff] }
   0x2   :  { %48 = vmatpush.msra.mxu0 %v23_v0  ;;  %121 = vmatpush.msra.mxu1 %v23_v0  ;;  %v20_v3 = vld [vmem:[%s756_s3] sm:$0xff] }
   0x3   :  { %191 = vmatpush.msra.mxu2 %v23_v0  ;;  %261 = vmatpush.msra.mxu3 %v23_v0  ;;  %v26_v4 = vld [vmem:[%s758_s2] sm:$0x3]  ;;  %v530_v39 = vld [vmem:[%s759_s0 + $0x2] sm:$0x3] }
   0x4   :  { %49 = vmatpush.msra.mxu0 %v22_v1  ;;  %122 = vmatpush.msra.mxu1 %v22_v1  ;;  %v652_v5 = vld [vmem:[%s757_s4] ss:$0 sm:$0xff]  ;;  %s602_s4 = smov 32  }
   0x5   :  { %192 = vmatpush.msra.mxu2 %v22_v1  ;;  %262 = vmatpush.msra.mxu3 %v22_v1  ;;  %v659_v8 = vld [vmem:[%s760_s1] sm:$0x3]  ;;  %s601_s1 = smov 96  }
   0x6   :  { %50 = vmatpush.msra.mxu0 %v21_v2  ;;  %123 = vmatpush.msra.mxu1 %v21_v2  ;;  %v27_v9 = vld [vmem:[%s759_s0] sm:$0x3]  ;;  %v106_v40 = vadd.f32 %v530_v39, %v659_v8 }
   0x7   :  { %193 = vmatpush.msra.mxu2 %v21_v2  ;;  %263 = vmatpush.msra.mxu3 %v21_v2  ;;  %v28_v10 = vadd.f32 %v27_v9, %v659_v8 }
   0x8   :  { %51 = vmatpush.msra.mxu0 %v20_v3  ;;  %124 = vmatpush.msra.mxu1 %v20_v3 }
   0x9   :  { %528 = vmatmul.msk.f32.vlgmr.msra.gmra.mxu0 %vm32_vm0, %v26_v4  ;;  %194 = vmatpush.msra.mxu2 %v20_v3 }
   0xa   :  { %264 = vmatpush.msra.mxu3 %v20_v3  ;;  %331 = vmatpush.msrb.mxu0 %v23_v0 }
   0xb   :  { %401 = vmatpush.msrb.mxu1 %v23_v0  ;;  %471 = vmatpush.msrb.mxu2 %v23_v0 }
   0xc   :  { %332 = vmatpush.msrb.mxu0 %v22_v1 }
   0xd   :  { %402 = vmatpush.msrb.mxu1 %v22_v1  ;;  %472 = vmatpush.msrb.mxu2 %v22_v1 }
   0xe   :  { %333 = vmatpush.msrb.mxu0 %v21_v2 }
   0xf   :  { %403 = vmatpush.msrb.mxu1 %v21_v2  ;;  %473 = vmatpush.msrb.mxu2 %v21_v2 }
  0x10   :  { %334 = vmatpush.msrb.mxu0 %v20_v3 }
  0x11   :  { %404 = vmatpush.msrb.mxu1 %v20_v3  ;;  %474 = vmatpush.msrb.mxu2 %v20_v3 }
  0x86   :  { %v53_v6 = vpop.f32.mrf.mxu0 }
  0x87   :  { %v54_v7 = vadd.f32 %v652_v5, %v53_v6 }
  0x89   :  { %77 = vrot.lane.b32.xlu0 %v54_v7, %s600_s28  ;;  %v56_v11 = vadd.f32 %v54_v7, %v28_v10 }
  0x8b   :  { %v529_v12 = vmul.f32 -1.442695, %v56_v11 }
  0x8d   :  { %558 = vpow2.f32 %v529_v12 }
  0x93   :  { %v559_v13 = vpop.eup %558 }
  0x94   :  { %v60_v14 = vadd.f32 1.0, %v559_v13 }
  0x96   :  { %560 = vrcp.f32 %v60_v14  ;;  %v72_v20 = vand.u32 2147483648, %v60_v14  ;;  %vm66_vm2 = vweird.f32 %v60_v14  ;;  %v70_v21 = vand.u32 2147483647, %v60_v14 }
  0x98   :  { %v73_v23 = vor.u32 1.1754944e-38, %v72_v20  ;;  %vm71_vm4 = vcmp.eq.f32.partialorder %v70_v21, 8.507059e+37 }
  0x9c   :  { %v561_v15 = vpop.eup %560 }
  0x9d   :  { %v62_v16 = vmul.f32 %v561_v15, %v60_v14  ;;  %vm67_vm1 = vweird.f32 %v561_v15 }
  0x9e   :  { %vm68_vm3 = vmor %vm66_vm2, %vm67_vm1 }
  0x9f   :  { %v63_v17 = vsub.f32 1.0, %v62_v16 }
  0xa1   :  { %v64_v18 = vmul.f32 %v561_v15, %v63_v17 }
  0xa3   :  { %v65_v19 = vadd.f32 %v561_v15, %v64_v18 }
  0xa5   :  { %v69_v22 = vsel %vm68_vm3, %v561_v15, %v65_v19 }
  0xa6   :  { %v74_v25 = vsel %vm71_vm4, %v73_v23, %v69_v22 }
  0xa7   :  { %v87_v31 = vsub.f32 1.0, %v74_v25 }
  0xfb   :  { %v78_v24 = vpop.permute.xlu0 %77 }
  0xfc   :  { %v80_v26 = vmul.f32 %v78_v24, %v74_v25 }
  0xfe   :  { %82 = vrot.lane.b32.xlu0 %v80_v26, %s600_s28 }
 0x170   :  { %v83_v27 = vpop.permute.xlu0 %82 }
 0x171   :  { %v85_v28 = vadd.f32 %v83_v27, %v28_v10 }
 0x173   :  { %562 = vtanh.f32 %v85_v28 }
 0x179   :  { %v563_v29 = vpop.eup %562 }
 0x17a   :  { %89 = vrot.lane.b32.xlu1 %v563_v29, %s601_s1 }
 0x182   :  { %93 = vrot.lane.b32.xlu1 %v26_v4, %s602_s4  ;;  %v534_v4 = vld [vmem:[%s759_s0 + $0x4] sm:$0x3] }
 0x183   :  { %v176_v6 = vadd.f32 %v534_v4, %v659_v8 }
 0x1ec   :  { %v90_v30 = vpop.permute.xlu1 %89 }
 0x1ed   :  { %v92_v33 = vmul.f32 %v90_v30, %v87_v31 }
 0x1f4   :  { %v94_v32 = vpop.permute.xlu1 %93 }
 0x1f5   :  { %v96_v34 = vmul.f32 %v94_v32, %v74_v25 }
 0x1f7   :  { %v97_v35 = vadd.f32 %v96_v34, %v92_v33 }
 0x1f9   :  { %99 = vrot.lane.b32.xlu2 %v97_v35, %s601_s1 }
 0x253   :  { %v100_v36 = vpop.permute.xlu2 %99 }
 0x254   :  { %103 = vst.msk [vmem:[%s761_s5] sm:$0x3] %vm102_vm5, %v100_v36  ;;  %531 = vmatmul.msk.f32.vlgmr.msra.gmra.mxu1 %vm32_vm0, %v100_v36 }
 0x2d1   :  { %v126_v37 = vpop.f32.mrf.mxu1 }
 0x2d2   :  { %v127_v38 = vadd.f32 %v652_v5, %v126_v37 }
 0x2d4   :  { %150 = vrot.lane.b32.xlu2 %v127_v38, %s600_s28  ;;  %v129_v41 = vadd.f32 %v127_v38, %v106_v40 }
 0x2d6   :  { %v532_v42 = vmul.f32 -1.442695, %v129_v41 }
 0x2d8   :  { %564 = vpow2.f32 %v532_v42 }
 0x2de   :  { %v565_v43 = vpop.eup %564 }
 0x2df   :  { %v133_v44 = vadd.f32 1.0, %v565_v43 }
 0x2e1   :  { %566 = vrcp.f32 %v133_v44  ;;  %v145_v50 = vand.u32 2147483648, %v133_v44  ;;  %vm139_vm7 = vweird.f32 %v133_v44  ;;  %v143_v51 = vand.u32 2147483647, %v133_v44 }
 0x2e3   :  { %v146_v53 = vor.u32 1.1754944e-38, %v145_v50  ;;  %vm144_vm9 = vcmp.eq.f32.partialorder %v143_v51, 8.507059e+37 }
 0x2e7   :  { %v567_v45 = vpop.eup %566 }
 0x2e8   :  { %v135_v46 = vmul.f32 %v567_v45, %v133_v44  ;;  %vm140_vm6 = vweird.f32 %v567_v45 }
 0x2e9   :  { %vm141_vm8 = vmor %vm139_vm7, %vm140_vm6 }
 0x2ea   :  { %v136_v47 = vsub.f32 1.0, %v135_v46 }
 0x2ec   :  { %v137_v48 = vmul.f32 %v567_v45, %v136_v47 }
 0x2ee   :  { %v138_v49 = vadd.f32 %v567_v45, %v137_v48 }
 0x2f0   :  { %v142_v52 = vsel %vm141_vm8, %v567_v45, %v138_v49 }
 0x2f1   :  { %v147_v55 = vsel %vm144_vm9, %v146_v53, %v142_v52 }
 0x2f2   :  { %v160_v60 = vsub.f32 1.0, %v147_v55  ;;  %v166_v62 = vmul.f32 %v147_v55, %v97_v35  ;;  %v538_v35 = vld [vmem:[%s759_s0 + $0x6] sm:$0x3] }
 0x2f3   :  { %v246_v36 = vadd.f32 %v538_v35, %v659_v8 }
 0x32e   :  { %v151_v54 = vpop.permute.xlu2 %150 }
 0x32f   :  { %v153_v56 = vmul.f32 %v151_v54, %v147_v55 }
 0x331   :  { %155 = vrot.lane.b32.xlu0 %v153_v56, %s600_s28 }
 0x3a3   :  { %v156_v57 = vpop.permute.xlu0 %155 }
 0x3a4   :  { %v158_v58 = vadd.f32 %v156_v57, %v106_v40 }
 0x3a6   :  { %568 = vtanh.f32 %v158_v58 }
 0x3ac   :  { %v569_v59 = vpop.eup %568 }
 0x3ad   :  { %162 = vrot.lane.b32.xlu1 %v569_v59, %s601_s1 }
 0x41f   :  { %v163_v61 = vpop.permute.xlu1 %162 }
 0x420   :  { %v165_v63 = vmul.f32 %v163_v61, %v160_v60 }
 0x422   :  { %v167_v0 = vadd.f32 %v166_v62, %v165_v63 }
 0x424   :  { %169 = vrot.lane.b32.xlu2 %v167_v0, %s601_s1 }
 0x47e   :  { %v170_v1 = vpop.permute.xlu2 %169 }
 0x47f   :  { %533 = vst.msk [vmem:[%s761_s5 + $0x2] sm:$0x3] %vm102_vm5, %v170_v1  ;;  %535 = vmatmul.msk.f32.vlgmr.msra.gmra.mxu2 %vm32_vm0, %v170_v1 }
 0x502   :  { %v196_v2 = vpop.f32.mrf.mxu2 }
 0x503   :  { %v197_v3 = vadd.f32 %v652_v5, %v196_v2 }
 0x505   :  { %220 = vrot.lane.b32.xlu0 %v197_v3, %s600_s28  ;;  %v199_v7 = vadd.f32 %v197_v3, %v176_v6 }
 0x507   :  { %v536_v9 = vmul.f32 -1.442695, %v199_v7 }
 0x509   :  { %570 = vpow2.f32 %v536_v9 }
 0x50f   :  { %v571_v10 = vpop.eup %570 }
 0x510   :  { %v203_v11 = vadd.f32 1.0, %v571_v10 }
 0x512   :  { %572 = vrcp.f32 %v203_v11  ;;  %v215_v17 = vand.u32 2147483648, %v203_v11  ;;  %vm209_vm11 = vweird.f32 %v203_v11  ;;  %v213_v18 = vand.u32 2147483647, %v203_v11 }
 0x514   :  { %v216_v20 = vor.u32 1.1754944e-38, %v215_v17  ;;  %vm214_vm13 = vcmp.eq.f32.partialorder %v213_v18, 8.507059e+37 }
 0x518   :  { %v573_v12 = vpop.eup %572 }
 0x519   :  { %v205_v13 = vmul.f32 %v573_v12, %v203_v11  ;;  %vm210_vm10 = vweird.f32 %v573_v12 }
 0x51a   :  { %vm211_vm12 = vmor %vm209_vm11, %vm210_vm10 }
 0x51b   :  { %v206_v14 = vsub.f32 1.0, %v205_v13 }
 0x51d   :  { %v207_v15 = vmul.f32 %v573_v12, %v206_v14 }
 0x51f   :  { %v208_v16 = vadd.f32 %v573_v12, %v207_v15 }
 0x521   :  { %v212_v19 = vsel %vm211_vm12, %v573_v12, %v208_v16 }
 0x522   :  { %v217_v22 = vsel %vm214_vm13, %v216_v20, %v212_v19 }
 0x523   :  { %v230_v27 = vsub.f32 1.0, %v217_v22  ;;  %v236_v29 = vmul.f32 %v217_v22, %v167_v0  ;;  %v542_v0 = vld [vmem:[%s759_s0 + $0x8] sm:$0x3] }
 0x524   :  { %v316_v1 = vadd.f32 %v542_v0, %v659_v8 }
 0x577   :  { %v221_v21 = vpop.permute.xlu0 %220 }
 0x578   :  { %v223_v23 = vmul.f32 %v221_v21, %v217_v22 }
 0x57a   :  { %225 = vrot.lane.b32.xlu1 %v223_v23, %s600_s28 }
 0x5ec   :  { %v226_v24 = vpop.permute.xlu1 %225 }
 0x5ed   :  { %v228_v25 = vadd.f32 %v226_v24, %v176_v6 }
 0x5ef   :  { %574 = vtanh.f32 %v228_v25 }
 0x5f5   :  { %v575_v26 = vpop.eup %574 }
 0x5f6   :  { %232 = vrot.lane.b32.xlu2 %v575_v26, %s601_s1 }
 0x650   :  { %v233_v28 = vpop.permute.xlu2 %232 }
 0x651   :  { %v235_v30 = vmul.f32 %v233_v28, %v230_v27 }
 0x653   :  { %v237_v31 = vadd.f32 %v236_v29, %v235_v30 }
 0x655   :  { %239 = vrot.lane.b32.xlu0 %v237_v31, %s601_s1 }
 0x6c7   :  { %v240_v32 = vpop.permute.xlu0 %239 }
 0x6c8   :  { %537 = vst.msk [vmem:[%s761_s5 + $0x4] sm:$0x3] %vm102_vm5, %v240_v32  ;;  %539 = vmatmul.msk.f32.vlgmr.msra.gmra.mxu3 %vm32_vm0, %v240_v32 }
 0x74b   :  { %v266_v33 = vpop.f32.mrf.mxu3 }
 0x74c   :  { %v267_v34 = vadd.f32 %v652_v5, %v266_v33 }
 0x74e   :  { %290 = vrot.lane.b32.xlu1 %v267_v34, %s600_s28  ;;  %v269_v37 = vadd.f32 %v267_v34, %v246_v36 }
 0x750   :  { %v540_v38 = vmul.f32 -1.442695, %v269_v37 }
 0x752   :  { %576 = vpow2.f32 %v540_v38 }
 0x758   :  { %v577_v39 = vpop.eup %576 }
 0x759   :  { %v273_v40 = vadd.f32 1.0, %v577_v39 }
 0x75b   :  { %578 = vrcp.f32 %v273_v40  ;;  %v285_v46 = vand.u32 2147483648, %v273_v40  ;;  %vm279_vm15 = vweird.f32 %v273_v40  ;;  %v283_v47 = vand.u32 2147483647, %v273_v40 }
 0x75d   :  { %v286_v49 = vor.u32 1.1754944e-38, %v285_v46  ;;  %vm284_vm2 = vcmp.eq.f32.partialorder %v283_v47, 8.507059e+37 }
 0x761   :  { %v579_v41 = vpop.eup %578 }
 0x762   :  { %v275_v42 = vmul.f32 %v579_v41, %v273_v40  ;;  %vm280_vm14 = vweird.f32 %v579_v41 }
 0x763   :  { %vm281_vm1 = vmor %vm279_vm15, %vm280_vm14 }
 0x764   :  { %v276_v43 = vsub.f32 1.0, %v275_v42 }
 0x766   :  { %v277_v44 = vmul.f32 %v579_v41, %v276_v43 }
 0x768   :  { %v278_v45 = vadd.f32 %v579_v41, %v277_v44 }
 0x76a   :  { %v282_v48 = vsel %vm281_vm1, %v579_v41, %v278_v45 }
 0x76b   :  { %v287_v51 = vsel %vm284_vm2, %v286_v49, %v282_v48 }
 0x76c   :  { %v300_v56 = vsub.f32 1.0, %v287_v51  ;;  %v306_v58 = vmul.f32 %v287_v51, %v237_v31  ;;  %v546_v31 = vld [vmem:[%s759_s0 + $0xa] sm:$0x3] }
 0x76d   :  { %v386_v32 = vadd.f32 %v546_v31, %v659_v8 }
 0x7c0   :  { %v291_v50 = vpop.permute.xlu1 %290 }
 0x7c1   :  { %v293_v52 = vmul.f32 %v291_v50, %v287_v51 }
 0x7c3   :  { %295 = vrot.lane.b32.xlu2 %v293_v52, %s600_s28 }
 0x81d   :  { %v296_v53 = vpop.permute.xlu2 %295 }
 0x81e   :  { %v298_v54 = vadd.f32 %v296_v53, %v246_v36 }
 0x820   :  { %580 = vtanh.f32 %v298_v54 }
 0x826   :  { %v581_v55 = vpop.eup %580 }
 0x827   :  { %302 = vrot.lane.b32.xlu0 %v581_v55, %s601_s1 }
 0x899   :  { %v303_v57 = vpop.permute.xlu0 %302 }
 0x89a   :  { %v305_v59 = vmul.f32 %v303_v57, %v300_v56 }
 0x89c   :  { %v307_v60 = vadd.f32 %v306_v58, %v305_v59 }
 0x89e   :  { %309 = vrot.lane.b32.xlu1 %v307_v60, %s601_s1 }
 0x910   :  { %v310_v61 = vpop.permute.xlu1 %309 }
 0x911   :  { %541 = vst.msk [vmem:[%s761_s5 + $0x6] sm:$0x3] %vm102_vm5, %v310_v61  ;;  %543 = vmatmul.msk.f32.vlgmr.msrb.gmra.mxu0 %vm32_vm0, %v310_v61 }
 0x98e   :  { %v336_v62 = vpop.f32.mrf.mxu0 }
 0x98f   :  { %v337_v63 = vadd.f32 %v652_v5, %v336_v62 }
 0x991   :  { %360 = vrot.lane.b32.xlu2 %v337_v63, %s600_s28  ;;  %v339_v2 = vadd.f32 %v337_v63, %v316_v1 }
 0x993   :  { %v544_v3 = vmul.f32 -1.442695, %v339_v2 }
 0x995   :  { %582 = vpow2.f32 %v544_v3 }
 0x99b   :  { %v583_v4 = vpop.eup %582 }
 0x99c   :  { %v343_v6 = vadd.f32 1.0, %v583_v4 }
 0x99e   :  { %584 = vrcp.f32 %v343_v6  ;;  %v355_v13 = vand.u32 2147483648, %v343_v6  ;;  %vm349_vm4 = vweird.f32 %v343_v6  ;;  %v353_v14 = vand.u32 2147483647, %v343_v6 }
 0x9a0   :  { %v356_v16 = vor.u32 1.1754944e-38, %v355_v13  ;;  %vm354_vm7 = vcmp.eq.f32.partialorder %v353_v14, 8.507059e+37 }
 0x9a4   :  { %v585_v7 = vpop.eup %584 }
 0x9a5   :  { %v345_v9 = vmul.f32 %v585_v7, %v343_v6  ;;  %vm350_vm3 = vweird.f32 %v585_v7 }
 0x9a6   :  { %vm351_vm6 = vmor %vm349_vm4, %vm350_vm3 }
 0x9a7   :  { %v346_v10 = vsub.f32 1.0, %v345_v9 }
 0x9a9   :  { %v347_v11 = vmul.f32 %v585_v7, %v346_v10 }
 0x9ab   :  { %v348_v12 = vadd.f32 %v585_v7, %v347_v11 }
 0x9ad   :  { %v352_v15 = vsel %vm351_vm6, %v585_v7, %v348_v12 }
 0x9ae   :  { %v357_v18 = vsel %vm354_vm7, %v356_v16, %v352_v15 }
 0x9af   :  { %v370_v23 = vsub.f32 1.0, %v357_v18  ;;  %v376_v25 = vmul.f32 %v357_v18, %v307_v60  ;;  %v550_v60 = vld [vmem:[%s759_s0 + $0xc] sm:$0x3] }
 0x9b0   :  { %v456_v61 = vadd.f32 %v550_v60, %v659_v8 }
 0x9eb   :  { %v361_v17 = vpop.permute.xlu2 %360 }
 0x9ec   :  { %v363_v19 = vmul.f32 %v361_v17, %v357_v18 }
 0x9ee   :  { %365 = vrot.lane.b32.xlu0 %v363_v19, %s600_s28 }
 0xa60   :  { %v366_v20 = vpop.permute.xlu0 %365 }
 0xa61   :  { %v368_v21 = vadd.f32 %v366_v20, %v316_v1 }
 0xa63   :  { %586 = vtanh.f32 %v368_v21 }
 0xa69   :  { %v587_v22 = vpop.eup %586 }
 0xa6a   :  { %372 = vrot.lane.b32.xlu1 %v587_v22, %s601_s1 }
 0xadc   :  { %v373_v24 = vpop.permute.xlu1 %372 }
 0xadd   :  { %v375_v26 = vmul.f32 %v373_v24, %v370_v23 }
 0xadf   :  { %v377_v27 = vadd.f32 %v376_v25, %v375_v26 }
 0xae1   :  { %379 = vrot.lane.b32.xlu2 %v377_v27, %s601_s1 }
 0xb3b   :  { %v380_v28 = vpop.permute.xlu2 %379 }
 0xb3c   :  { %545 = vst.msk [vmem:[%s761_s5 + $0x8] sm:$0x3] %vm102_vm5, %v380_v28  ;;  %547 = vmatmul.msk.f32.vlgmr.msrb.gmra.mxu1 %vm32_vm0, %v380_v28 }
 0xbb9   :  { %v406_v29 = vpop.f32.mrf.mxu1 }
 0xbba   :  { %v407_v30 = vadd.f32 %v652_v5, %v406_v29 }
 0xbbc   :  { %430 = vrot.lane.b32.xlu0 %v407_v30, %s600_s28  ;;  %v409_v33 = vadd.f32 %v407_v30, %v386_v32 }
 0xbbe   :  { %v548_v34 = vmul.f32 -1.442695, %v409_v33 }
 0xbc0   :  { %588 = vpow2.f32 %v548_v34 }
 0xbc6   :  { %v589_v35 = vpop.eup %588 }
 0xbc7   :  { %v413_v36 = vadd.f32 1.0, %v589_v35 }
 0xbc9   :  { %590 = vrcp.f32 %v413_v36  ;;  %v425_v42 = vand.u32 2147483648, %v413_v36  ;;  %vm419_vm9 = vweird.f32 %v413_v36  ;;  %v423_v43 = vand.u32 2147483647, %v413_v36 }
 0xbcb   :  { %v426_v45 = vor.u32 1.1754944e-38, %v425_v42  ;;  %vm424_vm11 = vcmp.eq.f32.partialorder %v423_v43, 8.507059e+37 }
 0xbcf   :  { %v591_v37 = vpop.eup %590 }
 0xbd0   :  { %v415_v38 = vmul.f32 %v591_v37, %v413_v36  ;;  %vm420_vm8 = vweird.f32 %v591_v37 }
 0xbd1   :  { %vm421_vm10 = vmor %vm419_vm9, %vm420_vm8 }
 0xbd2   :  { %v416_v39 = vsub.f32 1.0, %v415_v38 }
 0xbd4   :  { %v417_v40 = vmul.f32 %v591_v37, %v416_v39 }
 0xbd6   :  { %v418_v41 = vadd.f32 %v591_v37, %v417_v40 }
 0xbd8   :  { %v422_v44 = vsel %vm421_vm10, %v591_v37, %v418_v41 }
 0xbd9   :  { %v427_v47 = vsel %vm424_vm11, %v426_v45, %v422_v44 }
 0xbda   :  { %v440_v52 = vsub.f32 1.0, %v427_v47  ;;  %v446_v54 = vmul.f32 %v427_v47, %v377_v27 }
 0xc2e   :  { %v431_v46 = vpop.permute.xlu0 %430 }
 0xc2f   :  { %v433_v48 = vmul.f32 %v431_v46, %v427_v47 }
 0xc31   :  { %435 = vrot.lane.b32.xlu1 %v433_v48, %s600_s28 }
 0xca3   :  { %v436_v49 = vpop.permute.xlu1 %435 }
 0xca4   :  { %v438_v50 = vadd.f32 %v436_v49, %v386_v32 }
 0xca6   :  { %592 = vtanh.f32 %v438_v50 }
 0xcac   :  { %v593_v51 = vpop.eup %592 }
 0xcad   :  { %442 = vrot.lane.b32.xlu2 %v593_v51, %s601_s1 }
 0xd07   :  { %v443_v53 = vpop.permute.xlu2 %442 }
 0xd08   :  { %v445_v55 = vmul.f32 %v443_v53, %v440_v52 }
 0xd0a   :  { %v447_v56 = vadd.f32 %v446_v54, %v445_v55 }
 0xd0c   :  { %449 = vrot.lane.b32.xlu0 %v447_v56, %s601_s1 }
 0xd7e   :  { %v450_v57 = vpop.permute.xlu0 %449 }
 0xd7f   :  { %549 = vst.msk [vmem:[%s761_s5 + $0xa] sm:$0x3] %vm102_vm5, %v450_v57  ;;  %551 = vmatmul.msk.f32.vlgmr.msrb.gmra.mxu2 %vm32_vm0, %v450_v57 }
 0xe02   :  { %v476_v58 = vpop.f32.mrf.mxu2 }
 0xe03   :  { %v477_v59 = vadd.f32 %v652_v5, %v476_v58 }
 0xe05   :  { %500 = vrot.lane.b32.xlu1 %v477_v59, %s600_s28  ;;  %v479_v62 = vadd.f32 %v477_v59, %v456_v61 }
 0xe07   :  { %v552_v63 = vmul.f32 -1.442695, %v479_v62 }
 0xe09   :  { %594 = vpow2.f32 %v552_v63 }
 0xe0f   :  { %v595_v0 = vpop.eup %594 }
 0xe10   :  { %v483_v1 = vadd.f32 1.0, %v595_v0 }
 0xe12   :  { %596 = vrcp.f32 %v483_v1  ;;  %v495_v5 = vand.u32 2147483648, %v483_v1  ;;  %vm489_vm12 = vweird.f32 %v483_v1  ;;  %v493_v9 = vand.u32 2147483647, %v483_v1 }
 0xe14   :  { %v496_v11 = vor.u32 1.1754944e-38, %v495_v5  ;;  %vm494_vm14 = vcmp.eq.f32.partialorder %v493_v9, 8.507059e+37 }
 0xe18   :  { %v597_v2 = vpop.eup %596 }
 0xe19   :  { %v485_v3 = vmul.f32 %v597_v2, %v483_v1  ;;  %vm490_vm0 = vweird.f32 %v597_v2 }
 0xe1a   :  { %vm491_vm13 = vmor %vm489_vm12, %vm490_vm0 }
 0xe1b   :  { %v486_v4 = vsub.f32 1.0, %v485_v3 }
 0xe1d   :  { %v487_v6 = vmul.f32 %v597_v2, %v486_v4 }
 0xe1f   :  { %v488_v7 = vadd.f32 %v597_v2, %v487_v6 }
 0xe21   :  { %v492_v10 = vsel %vm491_vm13, %v597_v2, %v488_v7 }
 0xe22   :  { %v497_v12 = vsel %vm494_vm14, %v496_v11, %v492_v10 }
 0xe23   :  { %v510_v17 = vsub.f32 1.0, %v497_v12  ;;  %v516_v19 = vmul.f32 %v497_v12, %v447_v56 }
 0xe77   :  { %v501_v8 = vpop.permute.xlu1 %500 }
 0xe78   :  { %v503_v13 = vmul.f32 %v501_v8, %v497_v12 }
 0xe7a   :  { %505 = vrot.lane.b32.xlu2 %v503_v13, %s600_s28 }
 0xed4   :  { %v506_v14 = vpop.permute.xlu2 %505 }
 0xed5   :  { %v508_v15 = vadd.f32 %v506_v14, %v456_v61 }
 0xed7   :  { %598 = vtanh.f32 %v508_v15 }
 0xedd   :  { %v599_v16 = vpop.eup %598 }
 0xede   :  { %512 = vrot.lane.b32.xlu0 %v599_v16, %s601_s1 }
 0xf50   :  { %v513_v18 = vpop.permute.xlu0 %512 }
 0xf51   :  { %v515_v20 = vmul.f32 %v513_v18, %v510_v17 }
 0xf53   :  { %v517_v21 = vadd.f32 %v516_v19, %v515_v20 }
 0xf55   :  { %519 = vrot.lane.b32.xlu1 %v517_v21, %s601_s1 }
 0xfc7   :  { %v520_v22 = vpop.permute.xlu1 %519 }
 0xfc8   :  { %553 = vst.msk [vmem:[%s761_s5 + $0xc] sm:$0x3] %vm102_vm5, %v520_v22 }

// kernel: vae_forward.11
= control target key start
LH: loop header
LB: loop body
LE: loop exit
PB: predicated region body
PF: predicated region fallthrough
CT: control target
= control target key end

     0   :  { %s288_s0 = inlined_call_operand.vmem [shape: f32[14,32], index: 0, kind: input, shape index: {}]   ;;  %s289_s1 = inlined_call_operand.vmem [shape: f32[32,16], index: 1, kind: input, shape index: {}]   ;;  %s290_s2 = inlined_call_operand.vmem [shape: f32[1,16], index: 2, kind: input, shape index: {}]   ;;  %s291_s3 = inlined_call_operand.vmem [shape: s32[14,1], index: 3, kind: input, shape index: {}]   ;;  %s292_s4 = inlined_call_operand.hbm [shape: f32[1,1], index: 4, kind: output, shape index: {}]  }
   0x1   :  { %v23_v0 = vld [vmem:[%s289_s1 + $0x18] sm:$0xff]  ;;  %v22_v1 = vld [vmem:[%s289_s1 + $0x10] sm:$0xff]  ;;  %v21_v2 = vld [vmem:[%s289_s1 + $0x8] sm:$0xff] }
   0x2   :  { %47 = vmatpush.msra.mxu0 %v23_v0  ;;  %174 = vmatpush.msra.mxu1 %v23_v0 }
   0x3   :  { %9 = vsyncpa [#allocation3], 0  ;;  %v20_v3 = vld [vmem:[%s289_s1] sm:$0xff]  ;;  %vm28_vm0 = vcmask 261120   ;;  %v19_v5 = vld [vmem:[%s288_s0 + $0x8] sm:$0x3f]  ;;  %v88_v27 = vlaneseq }
   0x4   :  { %48 = vmatpush.msra.mxu0 %v22_v1  ;;  %175 = vmatpush.msra.mxu1 %v22_v1  ;;  %v18_v4 = vld [vmem:[%s288_s0] sm:$0xff]  ;;  %vm58_vm1 = vcmask 130048   ;;  %vm62_vm2 = vcmask 128000   ;;  %v220_v14 = vmov 0   ;;  %v87_v15 = vld [vmem:[%s291_s3 + $0x8] sm:$0x3f] }
   0x5   :  { %v183_v6 = vld [vmem:[%s290_s2] ss:$0 sm:$0xff]  ;;  %181 = vset.pattern.permute.xlu2 %v220_v14  ;;  %182 = vset.pattern.permute.xlu0 %v220_v14  ;;  %v89_v29 = vand.u32 127, %v88_v27  ;;  %vm116_vm6 = vcmask 7168   ;;  %v221_v44 = vmov 0.0   ;;  %vm107_vm7 = vcmp.ne.s32.totalorder %v87_v15, 0 }
   0x6   :  { %49 = vmatpush.msra.mxu0 %v21_v2  ;;  %176 = vmatpush.msra.mxu1 %v21_v2  ;;  %v86_v13 = vld [vmem:[%s291_s3] sm:$0xff]  ;;  %v173_v47 = vsel %vm107_vm7, 1.0, %v221_v44  ;;  %vm118_vm8 = vcmask 5120   ;;  %s222_s3 = smov [#allocation2]   ;;  %s161_s7 = sshll.u32 %s292_s4, 4  ;;  %vm152_vm13 = vcmask 0   ;;  %s162_s7 = int_to_ptr.hbm [resolvable:$true] %s161_s7 }
   0x7   :  { %91 = vperm.xlu2 %181, %v86_v13   ;;  %vm106_vm5 = vcmp.ne.s32.totalorder %v86_v13, 0  ;;  %v128_v48 = vsel %vm118_vm8, %v173_v47, 0.0  ;;  %s159_s30 = sshll.u32 %s222_s3, 4  ;;  %s160_s30 = int_to_ptr.vmem [resolvable:$true] %s159_s30 }
   0x8   :  { %50 = vmatpush.msra.mxu0 %v20_v3  ;;  %177 = vmatpush.msra.mxu1 %v20_v3  ;;  %v172_v45 = vsel %vm106_vm5, 1.0, %v221_v44 }
   0x9   :  { %170 = vmatmul.msk.f32.vlgmr.msra.gmra.mxu0 %vm28_vm0, %v18_v4  ;;  %171 = vmatmul.msk.f32.vlgmr.msra.gmra.mxu1 %vm28_vm0, %v19_v5  ;;  %v127_v46 = vsel %vm116_vm6, %v172_v45, 0.0 }
   0xa   :  { %v129_v49 = vadd.f32 %v128_v48, %v127_v46 }
   0xc   :  { %v130_v50 = vrot.slane %v129_v49, 4 }
   0xe   :  { %v131_v51 = vadd.f32 %v130_v50, %v129_v49 }
   0xf   :  { %94 = vperm.xlu2 %181, %v87_v15  }
  0x10   :  { %v132_v52 = vrot.slane %v131_v51, 2 }
  0x12   :  { %v133_v53 = vadd.f32 %v132_v52, %v131_v51 }
  0x14   :  { %v134_v54 = vrot.slane %v133_v53, 1 }
  0x16   :  { %v135_v55 = vadd.f32 %v134_v54, %v133_v53 }
  0x18   :  { %v136_v56 = vmax.f32 %v135_v55, 1.0 }
  0x1a   :  { %vm142_vm9 = vweird.f32 %v136_v56 }
  0x61   :  { %v92_v31 = vpop.permute.xlu2 %91 }
  0x62   :  { %vm96_vm3 = vcmp.eq.s32.totalorder %v89_v29, %v92_v31 }
  0x69   :  { %v95_v40 = vpop.permute.xlu2 %94 }
  0x6a   :  { %vm97_vm4 = vcmp.eq.s32.totalorder %v89_v29, %v95_v40 }
  0x86   :  { %v52_v7 = vpop.f32.mrf.mxu0  ;;  %v55_v9 = vpop.f32.mrf.mxu1 }
  0x87   :  { %v53_v8 = vadd.f32 %v183_v6, %v52_v7  ;;  %v56_v11 = vadd.f32 %v183_v6, %v55_v9  ;;  %v148_v7 = vand.u32 2147483648, %v136_v56 }
  0x89   :  { %v59_v10 = vsel %vm58_vm1, %v53_v8, -inf  ;;  %v63_v12 = vsel %vm62_vm2, %v56_v11, -inf }
  0x8a   :  { %60 = vmax.xlane.f32.xlu0 %v59_v10  ;;  %v146_v10 = vand.u32 2147483647, %v136_v56 }
  0x8c   :  { %vm147_vm12 = vcmp.eq.f32.partialorder %v146_v10, 8.507059e+37 }
  0x92   :  { %64 = vmax.xlane.f32.xlu0 %v63_v12  ;;  %v149_v12 = vor.u32 1.1754944e-38, %v148_v7 }
  0xfd   :  { %v61_v16 = vpop.xlane.xlu0 %60 }
  0xfe   :  { %v66_v17 = vsub.f32 %v53_v8, %v61_v16 }
 0x100   :  { %v68_v18 = vmul.f32 1.442695, %v66_v17 }
 0x102   :  { %184 = vpow2.f32 %v68_v18 }
 0x105   :  { %v65_v19 = vpop.xlane.xlu0 %64 }
 0x106   :  { %v67_v20 = vsub.f32 %v56_v11, %v65_v19 }
 0x108   :  { %v185_v21 = vpop.eup %184  ;;  %v70_v22 = vmul.f32 1.442695, %v67_v20 }
 0x109   :  { %v72_v23 = vsel %vm58_vm1, %v185_v21, 0.0 }
 0x10a   :  { %186 = vpow2.f32 %v70_v22  ;;  %73 = vadd.xlane.f32.xlu1 %v72_v23 }
 0x110   :  { %v187_v24 = vpop.eup %186 }
 0x111   :  { %v75_v25 = vsel %vm62_vm2, %v187_v24, 0.0 }
 0x112   :  { %76 = vadd.xlane.f32.xlu1 %v75_v25 }
 0x17d   :  { %v74_v26 = vpop.xlane.xlu1 %73 }
 0x17e   :  { %188 = vlog2.f32 %v74_v26 }
 0x184   :  { %v189_v28 = vpop.eup %188 }
 0x185   :  { %v79_v30 = vmul.f32 0.6931472, %v189_v28  ;;  %v77_v32 = vpop.xlane.xlu1 %76 }
 0x186   :  { %190 = vlog2.f32 %v77_v32 }
 0x187   :  { %v82_v33 = vadd.f32 %v79_v30, %v61_v16  ;;  %192 = vrcp.f32 %v136_v56 }
 0x189   :  { %v84_v34 = vsub.f32 %v53_v8, %v82_v33 }
 0x18b   :  { %v98_v35 = vsel %vm96_vm3, %v84_v34, 0.0 }
 0x18c   :  { %v191_v36 = vpop.eup %190  ;;  %v100_v37 = vsel %vm58_vm1, %v98_v35, 0.0 }
 0x18d   :  { %v81_v38 = vmul.f32 0.6931472, %v191_v36  ;;  %101 = vadd.xlane.f32.xlu0 %v100_v37  ;;  %v193_v58 = vpop.eup %192 }
 0x18e   :  { %v138_v60 = vmul.f32 %v193_v58, %v136_v56  ;;  %vm143_vm10 = vweird.f32 %v193_v58 }
 0x18f   :  { %v83_v39 = vadd.f32 %v81_v38, %v65_v19  ;;  %vm144_vm11 = vmor %vm142_vm9, %vm143_vm10 }
 0x190   :  { %v139_v0 = vsub.f32 1.0, %v138_v60 }
 0x191   :  { %v85_v41 = vsub.f32 %v56_v11, %v83_v39 }
 0x192   :  { %v140_v5 = vmul.f32 %v193_v58, %v139_v0 }
 0x193   :  { %v99_v42 = vsel %vm97_vm4, %v85_v41, 0.0 }
 0x194   :  { %v103_v43 = vsel %vm62_vm2, %v99_v42, 0.0  ;;  %v141_v9 = vadd.f32 %v193_v58, %v140_v5 }
 0x195   :  { %104 = vadd.xlane.f32.xlu1 %v103_v43 }
 0x196   :  { %v145_v14 = vsel %vm144_vm11, %v193_v58, %v141_v9 }
 0x197   :  { %v150_v16 = vsel %vm147_vm12, %v149_v12, %v145_v14 }
 0x200   :  { %v102_v57 = vpop.xlane.xlu0 %101 }
 0x201   :  { %v112_v59 = vsub.f32 0.0, %v102_v57 }
 0x203   :  { %v114_v62 = vmul.f32 %v172_v45, %v112_v59 }
 0x205   :  { %v117_v2 = vsel %vm116_vm6, %v114_v62, 0.0 }
 0x208   :  { %v105_v61 = vpop.xlane.xlu1 %104 }
 0x209   :  { %v113_v63 = vsub.f32 0.0, %v105_v61 }
 0x20b   :  { %v115_v1 = vmul.f32 %v173_v47, %v113_v63 }
 0x20d   :  { %v119_v3 = vsel %vm118_vm8, %v115_v1, 0.0 }
 0x20e   :  { %v120_v4 = vadd.f32 %v119_v3, %v117_v2 }
 0x210   :  { %v121_v6 = vrot.slane %v120_v4, 4 }
 0x212   :  { %v122_v8 = vadd.f32 %v121_v6, %v120_v4 }
 0x214   :  { %v123_v11 = vrot.slane %v122_v8, 2 }
 0x216   :  { %v124_v13 = vadd.f32 %v123_v11, %v122_v8 }
 0x218   :  { %v125_v15 = vrot.slane %v124_v13, 1 }
 0x21a   :  { %v126_v17 = vadd.f32 %v125_v15, %v124_v13 }
 0x21c   :  { %v151_v18 = vmul.f32 %v150_v16, %v126_v17 }
 0x21e   :  { %153 = vst.msk [vmem:[#allocation2] sm:$0x1] %vm152_vm13, %v151_v18 }
 0x21f   :  { %164 = dma.vmem_to_hbm [thread:$0]  %s160_s30, 16, %s162_s7, [#allocation3]  }
 0x220   :  { %218 = dma.done.wait [#allocation3], 16  }
 0x221   :  { %219 = vsyncadd [#allocation3], 4294967280 }
 0x222   :  { %169 = vsyncpa [#allocation3], 1 }

</bundles_post_ra>
